<compile_context>
chip_gen: v7x
topology: tpu7x:2x2x1
jax: 0.10.0
libtpu: 0.0.40
codegen_flags: <defaults>
</compile_context>

<pallas_src>
import math
import functools

import jax
import jax.numpy as jnp
from jax.experimental import pallas as pl
from jax.experimental.pallas import tpu as pltpu


def _exchanging_kernel(x_ref, wqkv_ref, bqkv_ref, wo_ref, bo_ref,
                       out_ref, attn_ref, *, n: int, dim_v: int, num_heads: int):
    """One grid step == one block of `bt` batch elements (rows flattened).

    x_ref    : [bt*N, Din]            f32
    wqkv_ref : [Din, 3*dim_v]         bf16 (pre-transposed, Q|K|V fused)
    bqkv_ref : [1, 3*dim_v]           f32
    wo_ref   : [dim_v, dim_v]         bf16 (pre-transposed fc_o weight)
    bo_ref   : [1, dim_v]             f32
    out_ref  : [bt*N, dim_v]          f32
    attn_ref : [num_heads, bt, N, N]  f32 (head-major -> free reshape to [H*B,N,N])

    NOTE: torch.softmax(..., dim=1) normalises over the *query* axis.  This is
    only valid because the token axis N is never tiled by the grid; if an N
    grid axis is ever added, the softmax needs an online/two-pass formulation.
    """
    rows, din = x_ref.shape
    bt = rows // n
    ds = dim_v // num_heads
    scale = 1.0 / math.sqrt(dim_v)

    # ---- fused Q/K/V projection: one bf16 MXU matmul over the whole block ----
    xb = x_ref[...].astype(jnp.bfloat16)
    qkv = jnp.dot(xb, wqkv_ref[...],
                  preferred_element_type=jnp.float32) + bqkv_ref[...]   # [bt*N, 3*dv]

    q2 = qkv[:, :dim_v]                        # unscaled (used for the residual)
    k2 = qkv[:, dim_v:2 * dim_v] * scale       # 1/sqrt(dim_v) folded into K
    v2 = qkv[:, 2 * dim_v:]

    # Head-major merge: [bt*N, dim_v] -> [H*bt, N, ds]; matches torch.cat(split, 0)
    # ordering (head index is the slow axis, batch index the fast one).
    def to_heads(t):
        return jnp.concatenate(
            [t[:, h * ds:(h + 1) * ds].reshape(bt, n, ds) for h in range(num_heads)],
            axis=0)

    qh = to_heads(q2)                                   # f32, kept for residual
    kh = to_heads(k2).astype(jnp.bfloat16)
    vh = to_heads(v2).astype(jnp.bfloat16)

    # ---- attention, batched over all (head, batch) pairs at once ----
    s = jnp.einsum('bqd,bkd->bqk', qh.astype(jnp.bfloat16), kh,
                   preferred_element_type=jnp.float32)                  # [H*bt, Nq, Nk]
    # torch.softmax(..., dim=1): normalise over the QUERY axis (axis 1).
    s = s - jnp.max(s, axis=1, keepdims=True)
    e = jnp.exp(s)
    a = e * pl.reciprocal(jnp.sum(e, axis=1, keepdims=True), approx=True)

    # Single full-slab attention store per grid step (no per-head partial stores).
    attn_ref[...] = a.reshape(num_heads, bt, n, n)

    av = jnp.einsum('bqk,bkd->bqd', a.astype(jnp.bfloat16), vh,
                    preferred_element_type=jnp.float32)                 # [H*bt, N, ds]
    oh = qh + av                                         # residual uses UNscaled Q

    # Back to channel-concatenated layout [bt, N, dim_v] -> [bt*N, dim_v].
    o = jnp.concatenate([oh[h * bt:(h + 1) * bt] for h in range(num_heads)], axis=-1)
    o2 = o.reshape(bt * n, dim_v)

    # out = out + relu(fc_o(out))
    fo = jnp.dot(o2.astype(jnp.bfloat16), wo_ref[...],
                 preferred_element_type=jnp.float32) + bo_ref[...]
    out_ref[...] = o2 + jnp.maximum(fo, 0.0)


def _pick_batch_block(B, N, Din, dim_v, num_heads, *,
                      target_rows=256, vmem_budget=48 << 20):
    """bt*N >= target MXU rows, bounded by a v7x-safe VMEM budget, grid >= 2."""
    bt = max(1, -(-target_rows // N))                 # fill MXU rows
    bt = min(bt, max(1, -(-B // 2)))                  # keep >= 2 grid steps (v7x 2 TCs)
    blk_bytes = lambda b: 2 * 4 * b * (N * Din + N * dim_v + num_heads * N * N)
    while bt > 1 and blk_bytes(bt) > vmem_budget:     # double-buffered io blocks
        bt = -(-bt // 2)
    return bt


def exchanging_forward(x, params, *, num_heads: int, batch_block=None):
    """x: [B, N, Din] float32.  Returns (out [B, N, dim_v], A [num_heads*B, N, N])."""
    B, N, Din = x.shape
    wq, bq, wk, bk, wv, bv, wo, bo = params
    dim_v = wq.shape[0]
    assert dim_v % num_heads == 0

    bt = batch_block if batch_block is not None else _pick_batch_block(
        B, N, Din, dim_v, num_heads)
    n_blocks = -(-B // bt)
    B_pad = n_blocks * bt

    # Flat row-blocked input; pad the batch (zero rows) instead of shrinking bt.
    x2 = x.reshape(B * N, Din).astype(jnp.float32)
    if B_pad != B:
        x2 = jnp.pad(x2, ((0, (B_pad - B) * N), (0, 0)))

    # Pre-transpose + fuse weights in the wrapper; bf16 for the MXU (free plumbing).
    wqkv = jnp.concatenate([wq.T, wk.T, wv.T], axis=1).astype(jnp.bfloat16)   # [Din, 3*dv]
    bqkv = jnp.concatenate([bq, bk, bv]).reshape(1, 3 * dim_v).astype(jnp.float32)
    wo_t = wo.T.astype(jnp.bfloat16)                                          # [dv, dv]
    bo2 = bo.reshape(1, dim_v).astype(jnp.float32)

    kernel = functools.partial(_exchanging_kernel, n=N, dim_v=dim_v,
                               num_heads=num_heads)

    ds = dim_v // num_heads
    flops = B_pad * (2 * N * Din * 3 * dim_v            # fused QKV projection
                     + 2 * 2 * num_heads * N * N * ds   # QK^T and AV per head
                     + 2 * N * dim_v * dim_v)           # fc_o
    bytes_accessed = (4 * B_pad * (N * Din + N * dim_v + num_heads * N * N)
                      + 2 * (Din * 3 * dim_v + dim_v * dim_v)
                      + 4 * (3 * dim_v + dim_v))
    cost = pl.CostEstimate(flops=int(flops),
                           transcendentals=int(B_pad * num_heads * N * N),
                           bytes_accessed=int(bytes_accessed))

    io_block_bytes = 2 * 4 * bt * (N * Din + N * dim_v + num_heads * N * N)
    vmem_limit = int(min(56 << 20, max(32 << 20, 2 * io_block_bytes + (8 << 20))))

    out2, attn4 = pl.pallas_call(
        kernel,
        out_shape=(
            jax.ShapeDtypeStruct((B_pad * N, dim_v), jnp.float32),
            jax.ShapeDtypeStruct((num_heads, B_pad, N, N), jnp.float32),
        ),
        grid_spec=pltpu.PrefetchScalarGridSpec(
            num_scalar_prefetch=0,
            grid=(n_blocks,),
            in_specs=[
                pl.BlockSpec((bt * N, Din), lambda i: (i, 0)),     # x rows
                pl.BlockSpec(wqkv.shape, lambda i: (0, 0)),        # fused QKV weight
                pl.BlockSpec(bqkv.shape, lambda i: (0, 0)),
                pl.BlockSpec(wo_t.shape, lambda i: (0, 0)),        # fc_o weight
                pl.BlockSpec(bo2.shape, lambda i: (0, 0)),
            ],
            out_specs=[
                pl.BlockSpec((bt * N, dim_v), lambda i: (i, 0)),
                pl.BlockSpec((num_heads, bt, N, N), lambda i: (0, i, 0, 0)),
            ],
        ),
        compiler_params=pltpu.CompilerParams(
            dimension_semantics=("parallel",),
            vmem_limit_bytes=vmem_limit),
        cost_estimate=cost,
    )(x2, wqkv, bqkv, wo_t, bo2)

    out = out2.reshape(B_pad, N, dim_v)[:B]
    # Head-major [H, B, N, N] -> [H*B, N, N] is a free reshape (no transpose).
    attn = attn4[:, :B].reshape(num_heads * B, N, N)
    return out, attn


def exchanging_reference(x, params, *, num_heads: int):
    """Pure-JAX f32 reference mirroring the PyTorch code, for correctness checking."""
    wq, bq, wk, bk, wv, bv, wo, bo = params
    dim_v = wq.shape[0]
    B, N, _ = x.shape
    ds = dim_v // num_heads

    q = x @ wq.T + bq
    k = x @ wk.T + bk
    v = x @ wv.T + bv

    # torch.cat(t.split(ds, 2), dim=0): [num_heads*B, N, ds], head-major
    split = lambda t: jnp.concatenate(
        [t[:, :, h * ds:(h + 1) * ds] for h in range(num_heads)], axis=0)
    q_, k_, v_ = split(q), split(k), split(v)

    scores = jnp.einsum("bqd,bkd->bqk", q_, k_) / math.sqrt(dim_v)
    a = jax.nn.softmax(scores, axis=1)                    # dim=1 == query axis
    o_ = q_ + jnp.einsum("bqk,bkd->bqd", a, v_)
    out = jnp.concatenate([o_[h * B:(h + 1) * B] for h in range(num_heads)], axis=2)
    out = out + jax.nn.relu(out @ wo.T + bo)
    return out, a


def init_params(key, in_channels, out_channels):
    ks = jax.random.split(key, 8)
    s_in = 1.0 / math.sqrt(in_channels)
    s_out = 1.0 / math.sqrt(out_channels)
    wq = jax.random.uniform(ks[0], (out_channels, in_channels), jnp.float32, -s_in, s_in)
    bq = jax.random.uniform(ks[1], (out_channels,), jnp.float32, -s_in, s_in)
    wk = jax.random.uniform(ks[2], (out_channels, in_channels), jnp.float32, -s_in, s_in)
    bk = jax.random.uniform(ks[3], (out_channels,), jnp.float32, -s_in, s_in)
    wv = jax.random.uniform(ks[4], (out_channels, in_channels), jnp.float32, -s_in, s_in)
    bv = jax.random.uniform(ks[5], (out_channels,), jnp.float32, -s_in, s_in)
    wo = jax.random.uniform(ks[6], (out_channels, out_channels), jnp.float32, -s_out, s_out)
    bo = jax.random.uniform(ks[7], (out_channels,), jnp.float32, -s_out, s_out)
    return (wq, bq, wk, bk, wv, bv, wo, bo)


if __name__ == "__main__":
    B, N = 8, 8                      # batch, number of atoms/tokens
    in_channels, out_channels = 32, 32
    num_heads = 4

    root = jax.random.PRNGKey(0)
    k_x, k_p = jax.random.split(root)
    x = jax.random.normal(k_x, (B, N, in_channels), jnp.float32)
    params = init_params(k_p, in_channels, out_channels)

    out, attn = exchanging_forward(x, params, num_heads=num_heads)
    out = jax.block_until_ready(out)
    attn = jax.block_until_ready(attn)

    out_ref, attn_ref = exchanging_reference(x, params, num_heads=num_heads)
    assert out.shape == (B, N, out_channels)
    assert attn.shape == (num_heads * B, N, N)
    # bf16 MXU operands + approx reciprocal -> relaxed tolerances vs f32 reference.
    assert jnp.allclose(out, out_ref, atol=2e-2, rtol=2e-2)
    assert jnp.allclose(attn, attn_ref, atol=2e-2, rtol=2e-2)

    print("KERNEL_OK")
</pallas_src>

<mosaic_0001>
module attributes {stable_mosaic.version = 11 : i64} {
  func.func @_exchanging_kernel(%arg0: i32, %arg1: memref<32x32xf32, #tpu.memory_space<vmem>>, %arg2: memref<32x96xbf16, #tpu.memory_space<vmem>>, %arg3: memref<1x96xf32, #tpu.memory_space<vmem>>, %arg4: memref<32x32xbf16, #tpu.memory_space<vmem>>, %arg5: memref<1x32xf32, #tpu.memory_space<vmem>>, %arg6: memref<32x32xf32, #tpu.memory_space<vmem>>, %arg7: memref<4x4x8x8xf32, #tpu.memory_space<vmem>>) attributes {dimension_semantics = [#tpu.dimension_semantics<parallel>], iteration_bounds = array<i64: 2>, scalar_prefetch = 0 : i64, scratch_operands = 0 : i64, tpu.core_type = #tpu.core_type<tc>, window_params = [{transform_indices = @transform_0, window_bounds = array<i64: 32, 32>}, {pipeline_mode = #tpu.pipeline_mode<synchronous>, transform_indices = @transform_1, window_bounds = array<i64: 32, 96>}, {pipeline_mode = #tpu.pipeline_mode<synchronous>, transform_indices = @transform_2, window_bounds = array<i64: 1, 96>}, {pipeline_mode = #tpu.pipeline_mode<synchronous>, transform_indices = @transform_3, window_bounds = array<i64: 32, 32>}, {pipeline_mode = #tpu.pipeline_mode<synchronous>, transform_indices = @transform_4, window_bounds = array<i64: 1, 32>}, {transform_indices = @transform_5, window_bounds = array<i64: 32, 32>}, {transform_indices = @transform_6, window_bounds = array<i64: 4, 4, 8, 8>}]} {
    %c0 = arith.constant 0 : index
    %c0_0 = arith.constant 0 : index
    %0 = vector.load %arg1[%c0, %c0_0] : memref<32x32xf32, #tpu.memory_space<vmem>>, vector<32x32xf32>
    %1 = arith.truncf %0 : vector<32x32xf32> to vector<32x32xbf16>
    %c0_1 = arith.constant 0 : index
    %c0_2 = arith.constant 0 : index
    %2 = vector.load %arg2[%c0_1, %c0_2] : memref<32x96xbf16, #tpu.memory_space<vmem>>, vector<32x96xbf16>
    %cst = arith.constant dense<0.000000e+00> : vector<32x96xf32>
    %3 = tpu.matmul %1, %2, %cst {dimension_numbers = #tpu.dot_dimension_numbers<[1], [0], [0], [1], [0, 0, 1, 1], [], []>} : vector<32x32xbf16>, vector<32x96xbf16>, vector<32x96xf32> -> vector<32x96xf32>
    %c0_3 = arith.constant 0 : index
    %c0_4 = arith.constant 0 : index
    %4 = vector.load %arg3[%c0_3, %c0_4] : memref<1x96xf32, #tpu.memory_space<vmem>>, vector<1x96xf32>
    %5 = vector.broadcast %4 : vector<1x96xf32> to vector<32x96xf32>
    %6 = arith.addf %3, %5 : vector<32x96xf32>
    %7 = vector.extract_strided_slice %6 {offsets = [0, 0], sizes = [32, 32], strides = [1, 1]} : vector<32x96xf32> to vector<32x32xf32>
    %8 = vector.extract_strided_slice %6 {offsets = [0, 32], sizes = [32, 32], strides = [1, 1]} : vector<32x96xf32> to vector<32x32xf32>
    %cst_5 = arith.constant 0.176776692 : f32
    %9 = vector.broadcast %cst_5 : f32 to vector<32x32xf32>
    %10 = arith.mulf %8, %9 : vector<32x32xf32>
    %11 = vector.extract_strided_slice %6 {offsets = [0, 64], sizes = [32, 32], strides = [1, 1]} : vector<32x96xf32> to vector<32x32xf32>
    %12 = vector.extract_strided_slice %7 {offsets = [0, 0], sizes = [32, 8], strides = [1, 1]} : vector<32x32xf32> to vector<32x8xf32>
    %13 = vector.shape_cast %12 : vector<32x8xf32> to vector<4x8x8xf32>
    %14 = vector.extract_strided_slice %7 {offsets = [0, 8], sizes = [32, 8], strides = [1, 1]} : vector<32x32xf32> to vector<32x8xf32>
    %15 = vector.shape_cast %14 : vector<32x8xf32> to vector<4x8x8xf32>
    %16 = vector.extract_strided_slice %7 {offsets = [0, 16], sizes = [32, 8], strides = [1, 1]} : vector<32x32xf32> to vector<32x8xf32>
    %17 = vector.shape_cast %16 : vector<32x8xf32> to vector<4x8x8xf32>
    %18 = vector.extract_strided_slice %7 {offsets = [0, 24], sizes = [32, 8], strides = [1, 1]} : vector<32x32xf32> to vector<32x8xf32>
    %19 = vector.shape_cast %18 : vector<32x8xf32> to vector<4x8x8xf32>
    %20 = tpu.concatenate %13, %15, %17, %19 in 0 : vector<4x8x8xf32>, vector<4x8x8xf32>, vector<4x8x8xf32>, vector<4x8x8xf32> -> vector<16x8x8xf32>
    %21 = vector.extract_strided_slice %10 {offsets = [0, 0], sizes = [32, 8], strides = [1, 1]} : vector<32x32xf32> to vector<32x8xf32>
    %22 = vector.shape_cast %21 : vector<32x8xf32> to vector<4x8x8xf32>
    %23 = vector.extract_strided_slice %10 {offsets = [0, 8], sizes = [32, 8], strides = [1, 1]} : vector<32x32xf32> to vector<32x8xf32>
    %24 = vector.shape_cast %23 : vector<32x8xf32> to vector<4x8x8xf32>
    %25 = vector.extract_strided_slice %10 {offsets = [0, 16], sizes = [32, 8], strides = [1, 1]} : vector<32x32xf32> to vector<32x8xf32>
    %26 = vector.shape_cast %25 : vector<32x8xf32> to vector<4x8x8xf32>
    %27 = vector.extract_strided_slice %10 {offsets = [0, 24], sizes = [32, 8], strides = [1, 1]} : vector<32x32xf32> to vector<32x8xf32>
    %28 = vector.shape_cast %27 : vector<32x8xf32> to vector<4x8x8xf32>
    %29 = tpu.concatenate %22, %24, %26, %28 in 0 : vector<4x8x8xf32>, vector<4x8x8xf32>, vector<4x8x8xf32>, vector<4x8x8xf32> -> vector<16x8x8xf32>
    %30 = arith.truncf %29 : vector<16x8x8xf32> to vector<16x8x8xbf16>
    %31 = vector.extract_strided_slice %11 {offsets = [0, 0], sizes = [32, 8], strides = [1, 1]} : vector<32x32xf32> to vector<32x8xf32>
    %32 = vector.shape_cast %31 : vector<32x8xf32> to vector<4x8x8xf32>
    %33 = vector.extract_strided_slice %11 {offsets = [0, 8], sizes = [32, 8], strides = [1, 1]} : vector<32x32xf32> to vector<32x8xf32>
    %34 = vector.shape_cast %33 : vector<32x8xf32> to vector<4x8x8xf32>
    %35 = vector.extract_strided_slice %11 {offsets = [0, 16], sizes = [32, 8], strides = [1, 1]} : vector<32x32xf32> to vector<32x8xf32>
    %36 = vector.shape_cast %35 : vector<32x8xf32> to vector<4x8x8xf32>
    %37 = vector.extract_strided_slice %11 {offsets = [0, 24], sizes = [32, 8], strides = [1, 1]} : vector<32x32xf32> to vector<32x8xf32>
    %38 = vector.shape_cast %37 : vector<32x8xf32> to vector<4x8x8xf32>
    %39 = tpu.concatenate %32, %34, %36, %38 in 0 : vector<4x8x8xf32>, vector<4x8x8xf32>, vector<4x8x8xf32>, vector<4x8x8xf32> -> vector<16x8x8xf32>
    %40 = arith.truncf %39 : vector<16x8x8xf32> to vector<16x8x8xbf16>
    %41 = arith.truncf %20 : vector<16x8x8xf32> to vector<16x8x8xbf16>
    "tpu.trace_start"() <{level = 10 : i32, message = "bqd,bkd->bqk"}> : () -> ()
    %cst_6 = arith.constant dense<0.000000e+00> : vector<16x8x8xf32>
    %42 = tpu.matmul %41, %30, %cst_6 {dimension_numbers = #tpu.dot_dimension_numbers<[2], [2], [1], [1], [0, 0, 0, 1, 1, 1], [0], [0]>} : vector<16x8x8xbf16>, vector<16x8x8xbf16>, vector<16x8x8xf32> -> vector<16x8x8xf32>
    "tpu.trace_stop"() : () -> ()
    %cst_7 = arith.constant dense<0xFF800000> : vector<16x8xf32>
    %43 = vector.multi_reduction <maximumf>, %42, %cst_7 [1] : vector<16x8x8xf32> to vector<16x8xf32>
    %44 = vector.shape_cast %43 : vector<16x8xf32> to vector<16x1x8xf32>
    %45 = vector.broadcast %44 : vector<16x1x8xf32> to vector<16x8x8xf32>
    %46 = arith.subf %42, %45 : vector<16x8x8xf32>
    %47 = math.exp %46 : vector<16x8x8xf32>
    %cst_8 = arith.constant dense<0.000000e+00> : vector<16x8xf32>
    %48 = vector.multi_reduction <add>, %47, %cst_8 [1] : vector<16x8x8xf32> to vector<16x8xf32>
    %49 = vector.shape_cast %48 : vector<16x8xf32> to vector<16x1x8xf32>
    %50 = tpu.reciprocal %49 {approx = true} : vector<16x1x8xf32> -> vector<16x1x8xf32>
    %51 = vector.broadcast %50 : vector<16x1x8xf32> to vector<16x8x8xf32>
    %52 = arith.mulf %47, %51 : vector<16x8x8xf32>
    %53 = vector.shape_cast %52 : vector<16x8x8xf32> to vector<4x4x8x8xf32>
    %c0_9 = arith.constant 0 : index
    %c0_10 = arith.constant 0 : index
    %c0_11 = arith.constant 0 : index
    %c0_12 = arith.constant 0 : index
    %54 = vector.load %arg7[%c0_9, %c0_10, %c0_11, %c0_12] : memref<4x4x8x8xf32, #tpu.memory_space<vmem>>, vector<4x4x8x8xf32>
    tpu.vector_store %arg7[%c0_9, %c0_10, %c0_11, %c0_12], %53 {strides = array<i32>} : memref<4x4x8x8xf32, #tpu.memory_space<vmem>>, vector<4x4x8x8xf32>,
    %55 = arith.truncf %52 : vector<16x8x8xf32> to vector<16x8x8xbf16>
    "tpu.trace_start"() <{level = 10 : i32, message = "bqk,bkd->bqd"}> : () -> ()
    %cst_13 = arith.constant dense<0.000000e+00> : vector<16x8x8xf32>
    %56 = tpu.matmul %55, %40, %cst_13 {dimension_numbers = #tpu.dot_dimension_numbers<[2], [1], [1], [2], [0, 0, 0, 1, 1, 2], [0], [0]>} : vector<16x8x8xbf16>, vector<16x8x8xbf16>, vector<16x8x8xf32> -> vector<16x8x8xf32>
    "tpu.trace_stop"() : () -> ()
    %57 = arith.addf %20, %56 : vector<16x8x8xf32>
    %58 = vector.extract_strided_slice %57 {offsets = [0, 0, 0], sizes = [4, 8, 8], strides = [1, 1, 1]} : vector<16x8x8xf32> to vector<4x8x8xf32>
    %59 = vector.extract_strided_slice %57 {offsets = [4, 0, 0], sizes = [4, 8, 8], strides = [1, 1, 1]} : vector<16x8x8xf32> to vector<4x8x8xf32>
    %60 = vector.extract_strided_slice %57 {offsets = [8, 0, 0], sizes = [4, 8, 8], strides = [1, 1, 1]} : vector<16x8x8xf32> to vector<4x8x8xf32>
    %61 = vector.extract_strided_slice %57 {offsets = [12, 0, 0], sizes = [4, 8, 8], strides = [1, 1, 1]} : vector<16x8x8xf32> to vector<4x8x8xf32>
    %62 = tpu.concatenate %58, %59, %60, %61 in 2 : vector<4x8x8xf32>, vector<4x8x8xf32>, vector<4x8x8xf32>, vector<4x8x8xf32> -> vector<4x8x32xf32>
    %63 = vector.shape_cast %62 : vector<4x8x32xf32> to vector<32x32xf32>
    %64 = arith.truncf %63 : vector<32x32xf32> to vector<32x32xbf16>
    %c0_14 = arith.constant 0 : index
    %c0_15 = arith.constant 0 : index
    %65 = vector.load %arg4[%c0_14, %c0_15] : memref<32x32xbf16, #tpu.memory_space<vmem>>, vector<32x32xbf16>
    %cst_16 = arith.constant dense<0.000000e+00> : vector<32x32xf32>
    %66 = tpu.matmul %64, %65, %cst_16 {dimension_numbers = #tpu.dot_dimension_numbers<[1], [0], [0], [1], [0, 0, 1, 1], [], []>} : vector<32x32xbf16>, vector<32x32xbf16>, vector<32x32xf32> -> vector<32x32xf32>
    %c0_17 = arith.constant 0 : index
    %c0_18 = arith.constant 0 : index
    %67 = vector.load %arg5[%c0_17, %c0_18] : memref<1x32xf32, #tpu.memory_space<vmem>>, vector<1x32xf32>
    %68 = vector.broadcast %67 : vector<1x32xf32> to vector<32x32xf32>
    %69 = arith.addf %66, %68 : vector<32x32xf32>
    %cst_19 = arith.constant 0.000000e+00 : f32
    %70 = vector.broadcast %cst_19 : f32 to vector<32x32xf32>
    %71 = arith.maximumf %69, %70 : vector<32x32xf32>
    %72 = arith.addf %63, %71 : vector<32x32xf32>
    %c0_20 = arith.constant 0 : index
    %c0_21 = arith.constant 0 : index
    %73 = vector.load %arg6[%c0_20, %c0_21] : memref<32x32xf32, #tpu.memory_space<vmem>>, vector<32x32xf32>
    tpu.vector_store %arg6[%c0_20, %c0_21], %72 {strides = array<i32>} : memref<32x32xf32, #tpu.memory_space<vmem>>, vector<32x32xf32>,
    return
  }
  func.func @transform_0(%arg0: i32) -> (i32, i32) {
    %c0_i32 = arith.constant 0 : i32
    %c0_i32_0 = arith.constant 0 : i32
    return %arg0, %c0_i32 : i32, i32
  }
  func.func @transform_1(%arg0: i32) -> (i32, i32) {
    %c0_i32 = arith.constant 0 : i32
    %c0_i32_0 = arith.constant 0 : i32
    %c0_i32_1 = arith.constant 0 : i32
    return %c0_i32, %c0_i32_0 : i32, i32
  }
  func.func @transform_2(%arg0: i32) -> (i32, i32) {
    %c0_i32 = arith.constant 0 : i32
    %c0_i32_0 = arith.constant 0 : i32
    %c0_i32_1 = arith.constant 0 : i32
    return %c0_i32, %c0_i32_0 : i32, i32
  }
  func.func @transform_3(%arg0: i32) -> (i32, i32) {
    %c0_i32 = arith.constant 0 : i32
    %c0_i32_0 = arith.constant 0 : i32
    %c0_i32_1 = arith.constant 0 : i32
    return %c0_i32, %c0_i32_0 : i32, i32
  }
  func.func @transform_4(%arg0: i32) -> (i32, i32) {
    %c0_i32 = arith.constant 0 : i32
    %c0_i32_0 = arith.constant 0 : i32
    %c0_i32_1 = arith.constant 0 : i32
    return %c0_i32, %c0_i32_0 : i32, i32
  }
  func.func @transform_5(%arg0: i32) -> (i32, i32) {
    %c0_i32 = arith.constant 0 : i32
    %c0_i32_0 = arith.constant 0 : i32
    return %arg0, %c0_i32 : i32, i32
  }
  func.func @transform_6(%arg0: i32) -> (i32, i32, i32, i32) {
    %c0_i32 = arith.constant 0 : i32
    %c0_i32_0 = arith.constant 0 : i32
    %c0_i32_1 = arith.constant 0 : i32
    %c0_i32_2 = arith.constant 0 : i32
    return %c0_i32, %arg0, %c0_i32_0, %c0_i32_1 : i32, i32, i32, i32
  }
}

</mosaic_0001>

<bundles_post_ra>
// kernel: tpu_custom_call.1
= control target key start
LH: loop header
LB: loop body
LE: loop exit
PB: predicated region body
PF: predicated region fallthrough
CT: control target
= control target key end

     0   :  { %12 = vsyncpa [#allocation3], 0  ;;  %s3874_s0 = inlined_call_operand.vmem [shape: f32[64,32], index: 0, kind: input, shape index: {}]   ;;  %s3875_s1 = inlined_call_operand.vmem [shape: bf16[32,96], index: 1, kind: input, shape index: {}]   ;;  %s3876_s2 = inlined_call_operand.vmem [shape: f32[1,96], index: 2, kind: input, shape index: {}]   ;;  %s3877_s3 = inlined_call_operand.vmem [shape: bf16[32,32], index: 3, kind: input, shape index: {}]   ;;  %s3878_s4 = inlined_call_operand.vmem [shape: f32[1,32], index: 4, kind: input, shape index: {}]   ;;  %s3879_s5 = inlined_call_operand.vmem [shape: f32[64,32], index: 5, kind: output, shape index: {0}]   ;;  %s3880_s6 = inlined_call_operand.hbm [shape: f32[4,8,8,8], index: 6, kind: output, shape index: {1}]  }
   0x1   :  { %14 = vsyncpa [#allocation3 + $0x1], 0  ;;  %s3269_s21 = smov 0   ;;  %s3271_s22 = smov 0  }
   0x2   :  { %s3273_s23 = smov 0   ;;  %s3275_s24 = smov 0  }
   0x3 LB: > { %s3290_s25 = sadd.s32 4294967295, %s3215_s24   ;;  %s2684_s26 = sadd.s32 4294967294, %s3215_s24   ;;  %s3215_s24 = sphi %s3275_s24, %s3886_s24   ;;  %s3211_s23 = sphi %s3273_s23, %s3885_s23   ;;  %s3207_s22 = sphi %s3271_s22, %s3884_s22   ;;  %s3203_s21 = sphi %s3269_s21, %s3883_s21  }
   0x4   : > { %s3294_s27 = sadd.s32 1, %s3215_s24   ;;  %s163_s28 = sadd.s32 1, %s3211_s23 }
   0x5   : > { %s160_s29 = ssub.s32 %s3215_s24, %s3294_s27  ;;  %p173_p0 = scmp.ne.s32.totalorder %s3211_s23, %s3207_s22 }
   0x6   : > { %p161_p1 = scmp.eq.s32.totalorder %s160_s29, 0  ;;  %p174_p2 = scmp.eq.s32.totalorder %s3290_s25, 1 }
   0x7   : > { %p179_p3 = scmp.ne.s32.totalorder %s3207_s22, %s3203_s21  ;;  %p180_p4 = scmp.eq.s32.totalorder %s2684_s26, 1 }
   0x8   : > { %s3305_s30 = scalar_select %p161_p1, %s3211_s23, %s163_s28  }
   0x9   : > { %p3307_p5 = por %p174_p2, %p173_p0  ;;  %p3311_p6 = por %p180_p4, %p179_p3 }
   0xa   : > { %p2687_p7 = scmp.ge.s32.totalorder %s3215_s24, 1  ;;  %p219_p8 = scmp.lt.s32.totalorder %s3215_s24, 3 }
   0xc   : > { %p220_p9 = pnand %p2687_p7, %p219_p8 }
   0xd   : > { %v3113_v0 = vld [vmem:[%s3875_s1] sm:$0xff] (!%p220_p9)   ;;  %s2689_s11 = sshll.u32 (!%p220_p9), %s3290_s25, 2  ;;  %v3114_v1 = vld [vmem:[%s3875_s1 + $0x8] sm:$0xff] (!%p220_p9)   ;;  %vm297_vm0 = vcmask (!%p220_p9), 261120   ;;  %s3217_s20 = smov (!%p220_p9), 112   ;;  %v3219_v22 = vmov (!%p220_p9), 0.0  }
   0xe   : > { %223 = sbr.rel (%p220_p9) target bundleno = 1367 (0x557), region = 40  ;;  %p255_p10 = scmp.lt.s32.totalorder (!%p220_p9), %s2689_s11, 7  ;;  %2813 = vmatprep.subr.bf16.mxu0 (!%p220_p9), %v3113_v0  ;;  %v2693_v8 = vld [vmem:[%s3876_s2] ss:$0 sm:$0xff] (!%p220_p9)  ;;  %2821 = vmatprep.subr.bf16.mxu1 (!%p220_p9), %v3219_v22  ;;  %vm3220_vm1 = vmmov (!%p220_p9), 0   ;;  %vm472_vm2 = vcmask (!%p220_p9), 64512  }
   0xf   : > { %2814 = vmatpush3.bf16.msra.mxu0 (!%p220_p9), %v3113_v0  ;;  %s3218_s26 = smov (!%p220_p9), 120   ;;  %2823 = vmatprep.mubr.msk.bf16.mxu1 (!%p220_p9), %vm3220_vm1, %v3219_v22  ;;  %s3221_s28 = smov (!%p220_p9), 104   ;;  %vm1596_vm3 = vcmask (!%p220_p9), 1043456   ;;  %vm2443_vm4 = vcmask (!%p220_p9), 130048   ;;  %vm2448_vm5 = vcmask (!%p220_p9), 195584  }
  0x10   : > { %2815 = vmatprep.subr.bf16.mxu0 (!%p220_p9), %v3114_v1  ;;  %s3222_s29 = smov (!%p220_p9), 96   ;;  %s3223_s9 = smov (!%p220_p9), 64  }
  0x11   : > { %s251_s10 = sand.u32 (!%p220_p9), 1, %s3207_s22   ;;  %s3224_s15 = smov (!%p220_p9), 8  }
  0x12   : > { %s2688_s12 = sshll.u32 (!%p220_p9), %s251_s10, 7  ;;  %s3225_s16 = smov (!%p220_p9), 16  }
  0x13   : > { %2816 = vmatpush3.bf16.msra.mxu0 (!%p220_p9), %v3114_v1  ;;  %s3572_s13 = scalar_lea.vmem (!%p220_p9), [#allocation2], %s2688_s12 }
  0x14   : > { %2827 = vmatprep.subr.bf16.mxu0 (!%p220_p9), %v3219_v22 }
  0x15   : > { %s3888_s11 = smov (!%p255_p10, %s2689_s11), 7 }
  0x16   : > { %s2690_s14 = sshll.u32 %s3888_s11, 3  ;;  %s2551_s11 = scalar_lea.sflag [#allocation3], %s251_s10 }
  0x17   : > { %s258_s17 = scalar_lea.vmem %s3874_s0, %s2690_s14 }
  0x18   : > { %v268_v2 = vld [vmem:[%s258_s17] sm:$0xff]  ;;  %v269_v3 = vld [vmem:[%s258_s17 + $0x8] sm:$0xff]  ;;  %v270_v4 = vld [vmem:[%s258_s17 + $0x10] sm:$0xff] }
  0x19   : > { %v272_v5 = vpack.c.bf16 %v269_v3, %v268_v2  ;;  %v271_v6 = vld [vmem:[%s258_s17 + $0x18] sm:$0xff] }
  0x1a   : > { %v273_v7 = vpack.c.bf16 %v271_v6, %v270_v4 }
  0x1b   : > { %2817 = vmatprep.mubr.msk.bf16.mxu0 %vm297_vm0, %v272_v5 }
  0x1c   : > { %2818 = vmatmul.mubr.msk.bf16.vlgmr.msra.gmra.mrb[0].mxu0 %vm297_vm0, %v273_v7 }
  0x1d   : > { %2829 = vmatprep.mubr.msk.bf16.mxu0 %vm3220_vm1, %v3219_v22 }
  0xef   : > { %v2819_v9 = vpop.f32.mrb[0].mxu0 }
  0xf0   : > { %v338_v10 = vpop.f32.mrb[1].mxu0  ;;  %v3343_v16 = vadd.f32 %v2819_v9, %v2693_v8 }
  0xf1   : > { %v3337_v11 = vadd.f32 %v2693_v8, %v338_v10  ;;  %v2820_v12 = vpop.f32.mrb[2].mxu0 }
  0xf2   : > { %v341_v13 = vpop.f32.mrb[3].mxu0  ;;  %v3339_v14 = vadd.f32 %v2820_v12, %v2693_v8  ;;  %v355_v21 = vmul.f32 0.17677669, %v3343_v16  ;;  %v455_v61 = vpack.c.bf16 %v3343_v16, %v3343_v16 }
  0xf3   : > { %v3341_v15 = vadd.f32 %v2693_v8, %v341_v13  ;;  %v353_v17 = vmul.f32 0.17677669, %v3337_v11  ;;  %v453_v53 = vpack.c.bf16 %v3337_v11, %v3337_v11 }
  0xf4   : > { %v356_v20 = vmul.f32 0.17677669, %v3339_v14  ;;  %v439_v27 = vpack.c.bf16 %v355_v21, %v355_v21  ;;  %v456_v60 = vpack.c.bf16 %v3339_v14, %v3339_v14 }
  0xf5   : > { %v354_v18 = vmul.f32 0.17677669, %v3341_v15  ;;  %v437_v25 = vpack.c.bf16 %v353_v17, %v353_v17  ;;  %v454_v51 = vpack.c.bf16 %v3341_v15, %v3341_v15 }
  0xf6   : > { %v3098_v23 = vpack.i.bf16 %v356_v20, %v355_v21  ;;  %v440_v26 = vpack.c.bf16 %v356_v20, %v356_v20 }
  0xf7   : > { %v3093_v19 = vpack.i.bf16 %v354_v18, %v353_v17  ;;  %v438_v24 = vpack.c.bf16 %v354_v18, %v354_v18 }
  0xf9   : > { %3094 = vrot.lane.b32.xlu1 %v3093_v19, %s3217_s20  ;;  %3084 = vrot.lane.b32.xlu0 %v3093_v19, %s3218_s26 }
  0xfd   : > { %3099 = vrot.lane.b32.xlu1 %v3098_v23, %s3217_s20  ;;  %3089 = vrot.lane.b32.xlu0 %v3098_v23, %s3218_s26 }
 0x101   : > { %3109 = vrot.lane.b32.xlu1 %v3098_v23, %s3221_s28  ;;  %3104 = vrot.lane.b32.xlu0 %v3093_v19, %s3221_s28 }
 0x105   : > { %520 = vrot.lane.b32.xlu1 %v438_v24, %s3222_s29  ;;  %470 = vrot.lane.b32.xlu0 %v437_v25, %s3222_s29 }
 0x109   : > { %618 = vrot.lane.b32.xlu1 %v440_v26, %s3222_s29  ;;  %569 = vrot.lane.b32.xlu0 %v439_v27, %s3222_s29 }
 0x16b   : > { %v3095_v28 = vpop.permute.xlu1 %3094  ;;  %v3085_v29 = vpop.permute.xlu0 %3084 }
 0x16c   : > { %v3087_v30 = vunpack.i.h.bf16 %v3085_v29  ;;  %v3086_v31 = vunpack.i.l.bf16 %v3085_v29  ;;  %v3097_v46 = vunpack.i.h.bf16 %v3095_v28  ;;  %v3096_v47 = vunpack.i.l.bf16 %v3095_v28 }
 0x16e   : > { %v442_v32 = vpack.c.bf16 %v3087_v30, %v3087_v30  ;;  %v441_v33 = vpack.c.bf16 %v3086_v31, %v3086_v31  ;;  %v446_v48 = vpack.c.bf16 %v3097_v46, %v3097_v46  ;;  %v445_v52 = vpack.c.bf16 %v3096_v47, %v3096_v47 }
 0x16f   : > { %v3100_v34 = vpop.permute.xlu1 %3099  ;;  %v3090_v35 = vpop.permute.xlu0 %3089 }
 0x170   : > { %716 = vrot.lane.b32.xlu1 %v442_v32, %s3222_s29  ;;  %667 = vrot.lane.b32.xlu0 %v441_v33, %s3222_s29  ;;  %v3092_v36 = vunpack.i.h.bf16 %v3090_v35  ;;  %v3091_v37 = vunpack.i.l.bf16 %v3090_v35  ;;  %v3102_v56 = vunpack.i.h.bf16 %v3100_v34  ;;  %v3101_v57 = vunpack.i.l.bf16 %v3100_v34 }
 0x172   : > { %v444_v40 = vpack.c.bf16 %v3092_v36, %v3092_v36  ;;  %v443_v41 = vpack.c.bf16 %v3091_v37, %v3091_v37  ;;  %v448_v58 = vpack.c.bf16 %v3102_v56, %v3102_v56  ;;  %v447_v59 = vpack.c.bf16 %v3101_v57, %v3101_v57 }
 0x173   : > { %v3367_v38 = vpop.permute.xlu1 %3109  ;;  %v3105_v39 = vpop.permute.xlu0 %3104 }
 0x174   : > { %363 = vrot.lane.b32.xlu1 %v3341_v15, %s3218_s26  ;;  %361 = vrot.lane.b32.xlu0 %v3337_v11, %s3218_s26  ;;  %v3107_v62 = vunpack.i.h.bf16 %v3105_v39  ;;  %v3106_v63 = vunpack.i.l.bf16 %v3105_v39  ;;  %v3112_v2 = vunpack.i.h.bf16 %v3367_v38  ;;  %v3111_v3 = vunpack.i.l.bf16 %v3367_v38 }
 0x176   : > { %v450_v0 = vpack.c.bf16 %v3107_v62, %v3107_v62  ;;  %v449_v1 = vpack.c.bf16 %v3106_v63, %v3106_v63  ;;  %v452_v4 = vpack.c.bf16 %v3112_v2, %v3112_v2  ;;  %v451_v5 = vpack.c.bf16 %v3111_v3, %v3111_v3 }
 0x177   : > { %v521_v42 = vpop.permute.xlu1 %520  ;;  %v471_v43 = vpop.permute.xlu0 %470 }
 0x178   : > { %v526_v44 = vsel %vm472_vm2, %v521_v42, 0  ;;  %814 = vrot.lane.b32.xlu1 %v444_v40, %s3222_s29  ;;  %765 = vrot.lane.b32.xlu0 %v443_v41, %s3222_s29  ;;  %v477_v45 = vsel %vm472_vm2, %v471_v43, 0 }
 0x179   : > { %2822 = vmatpush3.bf16.xpose.msra.mxu1 %v477_v45  ;;  %2828 = vmatpush3.bf16.xpose.msra.mxu0 %v526_v44 }
 0x17a   : > { %2839 = vmatprep.subr.bf16.mxu0 %v3219_v22  ;;  %2833 = vmatprep.subr.bf16.mxu1 %v3219_v22 }
 0x17b   : > { %v619_v49 = vpop.permute.xlu1 %618  ;;  %v570_v50 = vpop.permute.xlu0 %569 }
 0x17c   : > { %367 = vrot.lane.b32.xlu1 %v3339_v14, %s3218_s26  ;;  %365 = vrot.lane.b32.xlu0 %v3343_v16, %s3218_s26  ;;  %v624_v54 = vsel %vm472_vm2, %v619_v49, 0  ;;  %v575_v55 = vsel %vm472_vm2, %v570_v50, 0  ;;  %s3226_s26 = smov 24  }
 0x180   : > { %2830 = vmatmul.mubr.msk.bf16.vlgmr.msra.gmra.mrb[4].mxu0 %vm472_vm2, %v454_v51  ;;  %912 = vrot.lane.b32.xlu1 %v446_v48, %s3222_s29 }
 0x181   : > { %863 = vrot.lane.b32.xlu0 %v445_v52, %s3222_s29  ;;  %2824 = vmatmul.mubr.msk.bf16.vlgmr.msra.gmra.mrb[0].mxu1 %vm472_vm2, %v453_v53 }
 0x182   : > { %2834 = vmatpush3.bf16.xpose.msra.mxu1 %v575_v55  ;;  %2840 = vmatpush3.bf16.xpose.msra.mxu0 %v624_v54 }
 0x183   : > { %2835 = vmatprep.mubr.msk.bf16.mxu1 %vm3220_vm1, %v3219_v22  ;;  %2841 = vmatprep.mubr.msk.bf16.mxu0 %vm3220_vm1, %v3219_v22 }
 0x184   : > { %375 = vrot.lane.b32.xlu1 %v3341_v15, %s3217_s20  ;;  %2845 = vmatprep.subr.bf16.mxu1 %v3219_v22 }
 0x185   : > { %373 = vrot.lane.b32.xlu0 %v3337_v11, %s3217_s20  ;;  %2851 = vmatprep.subr.bf16.mxu0 %v3219_v22 }
 0x188   : > { %1010 = vrot.lane.b32.xlu1 %v448_v58, %s3222_s29 }
 0x189   : > { %2842 = vmatmul.mubr.msk.bf16.vlgmr.msra.gmra.mrb[8].mxu0 %vm472_vm2, %v456_v60  ;;  %961 = vrot.lane.b32.xlu0 %v447_v59, %s3222_s29 }
 0x18a   : > { %2836 = vmatmul.mubr.msk.bf16.vlgmr.msra.gmra.mrb[4].mxu1 %vm472_vm2, %v455_v61  ;;  %2853 = vmatprep.mubr.msk.bf16.mxu0 %vm3220_vm1, %v3219_v22 }
 0x18b   : > { %2847 = vmatprep.mubr.msk.bf16.mxu1 %vm3220_vm1, %v3219_v22 }
 0x18c   : > { %379 = vrot.lane.b32.xlu1 %v3339_v14, %s3217_s20 }
 0x18d   : > { %377 = vrot.lane.b32.xlu0 %v3343_v16, %s3217_s20 }
 0x190   : > { %1108 = vrot.lane.b32.xlu1 %v450_v0, %s3222_s29 }
 0x191   : > { %1059 = vrot.lane.b32.xlu0 %v449_v1, %s3222_s29 }
 0x194   : > { %387 = vrot.lane.b32.xlu1 %v3341_v15, %s3221_s28 }
 0x195   : > { %385 = vrot.lane.b32.xlu0 %v3337_v11, %s3221_s28 }
 0x198   : > { %1206 = vrot.lane.b32.xlu1 %v452_v4, %s3222_s29 }
 0x199   : > { %1157 = vrot.lane.b32.xlu0 %v451_v5, %s3222_s29 }
 0x19c   : > { %391 = vrot.lane.b32.xlu1 %v3339_v14, %s3221_s28 }
 0x19d   : > { %389 = vrot.lane.b32.xlu0 %v3343_v16, %s3221_s28 }
 0x1a0   : > { %1641 = vrot.lane.b32.xlu1 %v454_v51, %s3223_s9 }
 0x1a1   : > { %1591 = vrot.lane.b32.xlu0 %v453_v53, %s3223_s9 }
 0x1a4   : > { %1739 = vrot.lane.b32.xlu1 %v456_v60, %s3223_s9 }
 0x1a5   : > { %1690 = vrot.lane.b32.xlu0 %v455_v61, %s3223_s9 }
 0x1e2   : > { %v717_v6 = vpop.permute.xlu1 %716  ;;  %v668_v7 = vpop.permute.xlu0 %667 }
 0x1e3   : > { %v722_v8 = vsel %vm472_vm2, %v717_v6, 0  ;;  %v673_v9 = vsel %vm472_vm2, %v668_v7, 0 }
 0x1e4   : > { %2846 = vmatpush3.bf16.xpose.msra.mxu1 %v673_v9  ;;  %2852 = vmatpush3.bf16.xpose.msra.mxu0 %v722_v8 }
 0x1e5   : > { %2857 = vmatprep.subr.bf16.mxu1 %v3219_v22  ;;  %2863 = vmatprep.subr.bf16.mxu0 %v3219_v22 }
 0x1e6   : > { %v3441_v10 = vpop.permute.xlu1 %363  ;;  %v3443_v12 = vpop.permute.xlu0 %361 }
 0x1e7   : > { %v458_v13 = vpack.c.bf16 %v3441_v10, %v3441_v10  ;;  %v457_v17 = vpack.c.bf16 %v3443_v12, %v3443_v12 }
 0x1e9   : > { %1837 = vrot.lane.b32.xlu1 %v458_v13, %s3223_s9  ;;  %1788 = vrot.lane.b32.xlu0 %v457_v17, %s3223_s9 }
 0x1ea   : > { %v815_v18 = vpop.permute.xlu1 %814  ;;  %v766_v19 = vpop.permute.xlu0 %765 }
 0x1eb   : > { %v820_v20 = vsel %vm472_vm2, %v815_v18, 0  ;;  %v771_v21 = vsel %vm472_vm2, %v766_v19, 0  ;;  %2848 = vmatmul.mubr.msk.bf16.vlgmr.msra.gmra.mrb[8].mxu1 %vm472_vm2, %v457_v17  ;;  %2854 = vmatmul.mubr.msk.bf16.vlgmr.msra.gmra.mrb[12].mxu0 %vm472_vm2, %v458_v13 }
 0x1ec   : > { %2858 = vmatpush3.bf16.xpose.msra.mxu1 %v771_v21  ;;  %2864 = vmatpush3.bf16.xpose.msra.mxu0 %v820_v20 }
 0x1ed   : > { %2865 = vmatprep.mubr.msk.bf16.mxu0 %vm3220_vm1, %v3219_v22  ;;  %2859 = vmatprep.mubr.msk.bf16.mxu1 %vm3220_vm1, %v3219_v22 }
 0x1ee   : > { %v3459_v23 = vpop.permute.xlu1 %367  ;;  %v3461_v24 = vpop.permute.xlu0 %365  ;;  %2869 = vmatprep.subr.bf16.mxu1 %v3219_v22  ;;  %2875 = vmatprep.subr.bf16.mxu0 %v3219_v22 }
 0x1ef   : > { %v460_v25 = vpack.c.bf16 %v3459_v23, %v3459_v23  ;;  %v459_v26 = vpack.c.bf16 %v3461_v24, %v3461_v24 }
 0x1f1   : > { %1935 = vrot.lane.b32.xlu1 %v460_v25, %s3223_s9  ;;  %1886 = vrot.lane.b32.xlu0 %v459_v26, %s3223_s9 }
 0x1f2   : > { %v913_v27 = vpop.permute.xlu1 %912 }
 0x1f3   : > { %v918_v28 = vsel %vm472_vm2, %v913_v27, 0  ;;  %v864_v29 = vpop.permute.xlu0 %863  ;;  %2860 = vmatmul.mubr.msk.bf16.vlgmr.msra.gmra.mrb[12].mxu1 %vm472_vm2, %v459_v26  ;;  %2866 = vmatmul.mubr.msk.bf16.vlgmr.msra.gmra.mrb[16].mxu0 %vm472_vm2, %v460_v25 }
 0x1f4   : > { %v869_v30 = vsel %vm472_vm2, %v864_v29, 0  ;;  %2876 = vmatpush3.bf16.xpose.msra.mxu0 %v918_v28  ;;  %2877 = vmatprep.mubr.msk.bf16.mxu0 %vm3220_vm1, %v3219_v22 }
 0x1f5   : > { %2870 = vmatpush3.bf16.xpose.msra.mxu1 %v869_v30  ;;  %2871 = vmatprep.mubr.msk.bf16.mxu1 %vm3220_vm1, %v3219_v22 }
 0x1f6   : > { %v3479_v31 = vpop.permute.xlu1 %375  ;;  %2881 = vmatprep.subr.bf16.mxu1 %v3219_v22  ;;  %2887 = vmatprep.subr.bf16.mxu0 %v3219_v22 }
 0x1f7   : > { %v462_v32 = vpack.c.bf16 %v3479_v31, %v3479_v31  ;;  %v3485_v33 = vpop.permute.xlu0 %373 }
 0x1f8   : > { %v461_v34 = vpack.c.bf16 %v3485_v33, %v3485_v33 }
 0x1f9   : > { %2033 = vrot.lane.b32.xlu1 %v462_v32, %s3223_s9 }
 0x1fa   : > { %1984 = vrot.lane.b32.xlu0 %v461_v34, %s3223_s9  ;;  %v1011_v35 = vpop.permute.xlu1 %1010 }
 0x1fb   : > { %v1016_v36 = vsel %vm472_vm2, %v1011_v35, 0  ;;  %v962_v37 = vpop.permute.xlu0 %961  ;;  %2878 = vmatmul.mubr.msk.bf16.vlgmr.msra.gmra.mrb[20].mxu0 %vm472_vm2, %v462_v32 }
 0x1fc   : > { %v967_v38 = vsel %vm472_vm2, %v962_v37, 0  ;;  %2872 = vmatmul.mubr.msk.bf16.vlgmr.msra.gmra.mrb[16].mxu1 %vm472_vm2, %v461_v34  ;;  %2888 = vmatpush3.bf16.xpose.msra.mxu0 %v1016_v36 }
 0x1fd   : > { %2882 = vmatpush3.bf16.xpose.msra.mxu1 %v967_v38  ;;  %2889 = vmatprep.mubr.msk.bf16.mxu0 %vm3220_vm1, %v3219_v22 }
 0x1fe   : > { %v3497_v39 = vpop.permute.xlu1 %379  ;;  %2883 = vmatprep.mubr.msk.bf16.mxu1 %vm3220_vm1, %v3219_v22  ;;  %2893 = vmatprep.subr.bf16.mxu1 %v3219_v22 }
 0x1ff   : > { %v464_v40 = vpack.c.bf16 %v3497_v39, %v3497_v39  ;;  %v3504_v41 = vpop.permute.xlu0 %377  ;;  %2899 = vmatprep.subr.bf16.mxu0 %v3219_v22 }
 0x200   : > { %v463_v42 = vpack.c.bf16 %v3504_v41, %v3504_v41 }
 0x201   : > { %2131 = vrot.lane.b32.xlu1 %v464_v40, %s3223_s9 }
 0x202   : > { %2082 = vrot.lane.b32.xlu0 %v463_v42, %s3223_s9  ;;  %v1109_v43 = vpop.permute.xlu1 %1108 }
 0x203   : > { %v1114_v44 = vsel %vm472_vm2, %v1109_v43, 0  ;;  %v1060_v45 = vpop.permute.xlu0 %1059  ;;  %2890 = vmatmul.mubr.msk.bf16.vlgmr.msra.gmra.mrb[24].mxu0 %vm472_vm2, %v464_v40 }
 0x204   : > { %v1065_v46 = vsel %vm472_vm2, %v1060_v45, 0  ;;  %2884 = vmatmul.mubr.msk.bf16.vlgmr.msra.gmra.mrb[20].mxu1 %vm472_vm2, %v463_v42  ;;  %2900 = vmatpush3.bf16.xpose.msra.mxu0 %v1114_v44 }
 0x205   : > { %2894 = vmatpush3.bf16.xpose.msra.mxu1 %v1065_v46  ;;  %2901 = vmatprep.mubr.msk.bf16.mxu0 %vm3220_vm1, %v3219_v22 }
 0x206   : > { %v3517_v47 = vpop.permute.xlu1 %387  ;;  %2895 = vmatprep.mubr.msk.bf16.mxu1 %vm3220_vm1, %v3219_v22  ;;  %2905 = vmatprep.subr.bf16.mxu1 %v3219_v22 }
 0x207   : > { %v466_v48 = vpack.c.bf16 %v3517_v47, %v3517_v47  ;;  %v3524_v49 = vpop.permute.xlu0 %385  ;;  %2911 = vmatprep.subr.bf16.mxu0 %v3219_v22 }
 0x208   : > { %v465_v50 = vpack.c.bf16 %v3524_v49, %v3524_v49 }
 0x209   : > { %2229 = vrot.lane.b32.xlu1 %v466_v48, %s3223_s9 }
 0x20a   : > { %2180 = vrot.lane.b32.xlu0 %v465_v50, %s3223_s9  ;;  %v1207_v51 = vpop.permute.xlu1 %1206 }
 0x20b   : > { %v1212_v52 = vsel %vm472_vm2, %v1207_v51, 0  ;;  %v1158_v53 = vpop.permute.xlu0 %1157  ;;  %2902 = vmatmul.mubr.msk.bf16.vlgmr.msra.gmra.mrb[28].mxu0 %vm472_vm2, %v466_v48 }
 0x20c   : > { %v1163_v54 = vsel %vm472_vm2, %v1158_v53, 0  ;;  %2896 = vmatmul.mubr.msk.bf16.vlgmr.msra.gmra.mrb[24].mxu1 %vm472_vm2, %v465_v50  ;;  %2912 = vmatpush3.bf16.xpose.msra.mxu0 %v1212_v52 }
 0x20d   : > { %2906 = vmatpush3.bf16.xpose.msra.mxu1 %v1163_v54  ;;  %2913 = vmatprep.mubr.msk.bf16.mxu0 %vm3220_vm1, %v3219_v22 }
 0x20e   : > { %v3538_v55 = vpop.permute.xlu1 %391  ;;  %2907 = vmatprep.mubr.msk.bf16.mxu1 %vm3220_vm1, %v3219_v22  ;;  %2917 = vmatprep.subr.bf16.mxu1 %v3219_v22 }
 0x20f   : > { %v468_v56 = vpack.c.bf16 %v3538_v55, %v3538_v55  ;;  %v3545_v57 = vpop.permute.xlu0 %389  ;;  %2923 = vmatprep.subr.bf16.mxu0 %v3219_v22 }
 0x210   : > { %v467_v58 = vpack.c.bf16 %v3545_v57, %v3545_v57 }
 0x211   : > { %2327 = vrot.lane.b32.xlu1 %v468_v56, %s3223_s9 }
 0x212   : > { %2278 = vrot.lane.b32.xlu0 %v467_v58, %s3223_s9  ;;  %v1642_v59 = vpop.permute.xlu1 %1641 }
 0x213   : > { %v1647_v60 = vsel %vm1596_vm3, %v1642_v59, 0  ;;  %v1592_v61 = vpop.permute.xlu0 %1591  ;;  %2914 = vmatmul.mubr.msk.bf16.vlgmr.msra.gmra.mrb[32].mxu0 %vm472_vm2, %v468_v56 }
 0x214   : > { %v1598_v62 = vsel %vm1596_vm3, %v1592_v61, 0  ;;  %2908 = vmatmul.mubr.msk.bf16.vlgmr.msra.gmra.mrb[28].mxu1 %vm472_vm2, %v467_v58  ;;  %2924 = vmatpush3.bf16.msra.mxu0 %v1647_v60 }
 0x215   : > { %2918 = vmatpush3.bf16.msra.mxu1 %v1598_v62  ;;  %2919 = vmatprep.mubr.msk.bf16.mxu1 %vm3220_vm1, %v3219_v22 }
 0x216   : > { %2925 = vmatprep.mubr.msk.bf16.mxu0 %vm3220_vm1, %v3219_v22  ;;  %2929 = vmatprep.subr.bf16.mxu1 %v3219_v22 }
 0x217   : > { %2935 = vmatprep.subr.bf16.mxu0 %v3219_v22 }
 0x253   : > { %v562_v63 = vpop.f32.mrb[4].mxu0 }
 0x254   : > { %v513_v0 = vpop.f32.mrb[0].mxu1  ;;  %v1261_v1 = vsel %vm472_vm2, %v562_v63, -inf  ;;  %v2831_v2 = vpop.f32.mrb[5].mxu0 }
 0x255   : > { %v1254_v3 = vsel %vm472_vm2, %v513_v0, -inf  ;;  %v1262_v4 = vrot.slane %v1261_v1, 4  ;;  %v2825_v5 = vpop.f32.mrb[1].mxu1  ;;  %v565_v6 = vpop.f32.mrb[6].mxu0 }
 0x256   : > { %v1255_v7 = vrot.slane %v1254_v3, 4  ;;  %v516_v8 = vpop.f32.mrb[2].mxu1  ;;  %v2832_v9 = vpop.f32.mrb[7].mxu0 }
 0x257   : > { %v1263_v13 = vmax.f32 %v1261_v1, %v1262_v4  ;;  %v2826_v17 = vpop.f32.mrb[3].mxu1 }
 0x258   : > { %v1256_v18 = vmax.f32 %v1254_v3, %v1255_v7 }
 0x259   : > { %v1264_v19 = vrot.slane %v1263_v13, 2 }
 0x25a   : > { %v1257_v20 = vrot.slane %v1256_v18, 2 }
 0x25b   : > { %v1265_v21 = vmax.f32 %v1263_v13, %v1264_v19 }
 0x25c   : > { %v1258_v25 = vmax.f32 %v1256_v18, %v1257_v20  ;;  %v660_v26 = vpop.f32.mrb[8].mxu0 }
 0x25d   : > { %v1266_v27 = vrot.slane %v1265_v21, 1  ;;  %v1275_v28 = vsel %vm472_vm2, %v660_v26, -inf  ;;  %v611_v29 = vpop.f32.mrb[4].mxu1  ;;  %v2843_v30 = vpop.f32.mrb[9].mxu0 }
 0x25e   : > { %v1259_v32 = vrot.slane %v1258_v25, 1  ;;  %v1276_v34 = vrot.slane %v1275_v28, 4  ;;  %v1268_v35 = vsel %vm472_vm2, %v611_v29, -inf  ;;  %v2837_v36 = vpop.f32.mrb[5].mxu1  ;;  %v663_v37 = vpop.f32.mrb[10].mxu0 }
 0x25f   : > { %v1267_v38 = vmax.f32 %v1265_v21, %v1266_v27  ;;  %v1269_v40 = vrot.slane %v1268_v35, 4  ;;  %v614_v42 = vpop.f32.mrb[6].mxu1  ;;  %v2844_v43 = vpop.f32.mrb[11].mxu0 }
 0x260   : > { %v1260_v44 = vmax.f32 %v1258_v25, %v1259_v32  ;;  %v1277_v45 = vmax.f32 %v1275_v28, %v1276_v34  ;;  %v2838_v46 = vpop.f32.mrb[7].mxu1 }
 0x261   : > { %v1367_v48 = vsub.f32 %v562_v63, %v1267_v38  ;;  %v1270_v50 = vmax.f32 %v1268_v35, %v1269_v40 }
 0x262   : > { %v1366_v51 = vsub.f32 %v513_v0, %v1260_v44  ;;  %v1278_v52 = vrot.slane %v1277_v45, 2 }
 0x263   : > { %v1384_v53 = vmul.f32 1.442695, %v1367_v48  ;;  %v1271_v54 = vrot.slane %v1270_v50, 2 }
 0x264   : > { %v1382_v56 = vmul.f32 1.442695, %v1366_v51  ;;  %v1279_v58 = vmax.f32 %v1277_v45, %v1278_v52 }
 0x265   : > { %3117 = vpow2.f32 %v1384_v53  ;;  %v1272_v59 = vmax.f32 %v1270_v50, %v1271_v54  ;;  %v1740_v54 = vpop.permute.xlu1 %1739 }
 0x266   : > { %3119 = vpow2.f32 %v1382_v56  ;;  %v1280_v60 = vrot.slane %v1279_v58, 1 }
 0x267   : > { %v1273_v61 = vrot.slane %v1272_v59, 1 }
 0x268   : > { %v1281_v62 = vmax.f32 %v1279_v58, %v1280_v60  ;;  %v1691_v58 = vpop.permute.xlu0 %1690 }
 0x269   : > { %v1274_v1 = vmax.f32 %v1272_v59, %v1273_v61  ;;  %v1745_v61 = vsel %vm1596_vm3, %v1740_v54, 0 }
 0x26a   : > { %v1369_v2 = vsub.f32 %v660_v26, %v1281_v62  ;;  %v1696_v62 = vsel %vm1596_vm3, %v1691_v58, 0 }
 0x26b   : > { %v1368_v3 = vsub.f32 %v611_v29, %v1274_v1 }
 0x26c   : > { %v1388_v4 = vmul.f32 1.442695, %v1369_v2 }
 0x26d   : > { %v1386_v5 = vmul.f32 1.442695, %v1368_v3 }
 0x26e   : > { %3121 = vpow2.f32 %v1388_v4  ;;  %v1838_v4 = vpop.permute.xlu1 %1837 }
 0x26f   : > { %v3118_v63 = vpop.eup %3117  ;;  %3123 = vpow2.f32 %v1386_v5 }
 0x270   : > { %v3120_v0 = vpop.eup %3119  ;;  %v1421_v6 = vsel %vm472_vm2, %v3118_v63, 0.0 }
 0x271   : > { %v1414_v7 = vsel %vm472_vm2, %v3120_v0, 0.0  ;;  %v1422_v8 = vrot.slane %v1421_v6, 4 }
 0x272   : > { %v1415_v9 = vrot.slane %v1414_v7, 4 }
 0x273   : > { %v1423_v13 = vadd.f32 %v1422_v8, %v1421_v6 }
 0x274   : > { %v1416_v17 = vadd.f32 %v1415_v9, %v1414_v7  ;;  %v1843_v7 = vsel %vm1596_vm3, %v1838_v4, 0 }
 0x275   : > { %v1424_v18 = vrot.slane %v1423_v13, 2 }
 0x276   : > { %v1417_v19 = vrot.slane %v1416_v17, 2 }
 0x277   : > { %v1425_v20 = vadd.f32 %v1424_v18, %v1423_v13 }
 0x278   : > { %v3122_v21 = vpop.eup %3121  ;;  %v1418_v25 = vadd.f32 %v1417_v19, %v1416_v17 }
 0x279   : > { %v3124_v26 = vpop.eup %3123  ;;  %v1426_v27 = vrot.slane %v1425_v20, 1  ;;  %v1435_v28 = vsel %vm472_vm2, %v3122_v21, 0.0 }
 0x27a   : > { %v1419_v29 = vrot.slane %v1418_v25, 1  ;;  %v1436_v30 = vrot.slane %v1435_v28, 4  ;;  %v1428_v32 = vsel %vm472_vm2, %v3124_v26, 0.0 }
 0x27b   : > { %v1427_v34 = vadd.f32 %v1426_v27, %v1425_v20  ;;  %v1429_v35 = vrot.slane %v1428_v32, 4 }
 0x27c   : > { %v1420_v36 = vadd.f32 %v1419_v29, %v1418_v25  ;;  %v1437_v37 = vadd.f32 %v1436_v30, %v1435_v28 }
 0x27d   : > { %3125 = vrcp.f32 %v1427_v34  ;;  %v1430_v38 = vadd.f32 %v1429_v35, %v1428_v32 }
 0x27e   : > { %3127 = vrcp.f32 %v1420_v36  ;;  %v1438_v40 = vrot.slane %v1437_v37, 2 }
 0x27f   : > { %v1431_v42 = vrot.slane %v1430_v38, 2 }
 0x280   : > { %v1439_v43 = vadd.f32 %v1438_v40, %v1437_v37 }
 0x281   : > { %v1432_v44 = vadd.f32 %v1431_v42, %v1430_v38 }
 0x282   : > { %v1440_v45 = vrot.slane %v1439_v43, 1 }
 0x283   : > { %v1433_v46 = vrot.slane %v1432_v44, 1 }
 0x284   : > { %v1441_v48 = vadd.f32 %v1440_v45, %v1439_v43 }
 0x285   : > { %v1434_v50 = vadd.f32 %v1433_v46, %v1432_v44 }
 0x286   : > { %3129 = vrcp.f32 %v1441_v48 }
 0x287   : > { %v3126_v51 = vpop.eup %3125  ;;  %3131 = vrcp.f32 %v1434_v50 }
 0x288   : > { %v3128_v52 = vpop.eup %3127  ;;  %v1543_v53 = vmul.f32 %v3126_v51, %v3118_v63  ;;  %v1789_v63 = vpop.permute.xlu0 %1788 }
 0x289   : > { %v1542_v56 = vmul.f32 %v3128_v52, %v3120_v0  ;;  %v1794_v8 = vsel %vm1596_vm3, %v1789_v63, 0 }
 0x28a   : > { %1559 = vst.msk [vmem:[%s3572_s13 + $0x8] sm:$0xff] %vm472_vm2, %v1543_v53  ;;  %v1575_v59 = vpack.c.bf16 %v1543_v53, %v1543_v53 }
 0x28b   : > { %1558 = vst.msk [vmem:[%s3572_s13] sm:$0xff] %vm472_vm2, %v1542_v56  ;;  %v1574_v60 = vpack.c.bf16 %v1542_v56, %v1542_v56 }
 0x28c   : > { %2926 = vmatmul.mubr.msk.bf16.vlgmr.msra.gmra.mrb[36].mxu0 %vm472_vm2, %v1575_v59 }
 0x28d   : > { %2920 = vmatmul.mubr.msk.bf16.vlgmr.msra.gmra.mrb[32].mxu1 %vm472_vm2, %v1574_v60  ;;  %2936 = vmatpush3.bf16.msra.mxu0 %v1745_v61 }
 0x28e   : > { %2930 = vmatpush3.bf16.msra.mxu1 %v1696_v62  ;;  %2931 = vmatprep.mubr.msk.bf16.mxu1 %vm3220_vm1, %v3219_v22 }
 0x28f   : > { %2937 = vmatprep.mubr.msk.bf16.mxu0 %vm3220_vm1, %v3219_v22  ;;  %2941 = vmatprep.subr.bf16.mxu1 %v3219_v22 }
 0x290   : > { %v3130_v1 = vpop.eup %3129  ;;  %2947 = vmatprep.subr.bf16.mxu0 %v3219_v22 }
 0x291   : > { %v3132_v2 = vpop.eup %3131  ;;  %v1545_v3 = vmul.f32 %v3130_v1, %v3122_v21 }
 0x292   : > { %v1544_v5 = vmul.f32 %v3132_v2, %v3124_v26 }
 0x293   : > { %1561 = vst.msk [vmem:[%s3572_s13 + $0x18] sm:$0xff] %vm472_vm2, %v1545_v3  ;;  %v1577_v0 = vpack.c.bf16 %v1545_v3, %v1545_v3 }
 0x294   : > { %1560 = vst.msk [vmem:[%s3572_s13 + $0x10] sm:$0xff] %vm472_vm2, %v1544_v5  ;;  %v1576_v6 = vpack.c.bf16 %v1544_v5, %v1544_v5 }
 0x295   : > { %2938 = vmatmul.mubr.msk.bf16.vlgmr.msra.gmra.mrb[40].mxu0 %vm472_vm2, %v1577_v0 }
 0x296   : > { %2932 = vmatmul.mubr.msk.bf16.vlgmr.msra.gmra.mrb[36].mxu1 %vm472_vm2, %v1576_v6  ;;  %2948 = vmatpush3.bf16.msra.mxu0 %v1843_v7 }
 0x297   : > { %2942 = vmatpush3.bf16.msra.mxu1 %v1794_v8  ;;  %2943 = vmatprep.mubr.msk.bf16.mxu1 %vm3220_vm1, %v3219_v22 }
 0x298   : > { %2949 = vmatprep.mubr.msk.bf16.mxu0 %vm3220_vm1, %v3219_v22  ;;  %2953 = vmatprep.subr.bf16.mxu1 %v3219_v22 }
 0x299   : > { %2959 = vmatprep.subr.bf16.mxu0 %v3219_v22 }
 0x2be   : > { %v709_v9 = vpop.f32.mrb[8].mxu1  ;;  %v758_v13 = vpop.f32.mrb[12].mxu0 }
 0x2bf   : > { %v1282_v17 = vsel %vm472_vm2, %v709_v9, -inf  ;;  %v1289_v18 = vsel %vm472_vm2, %v758_v13, -inf  ;;  %v2849_v19 = vpop.f32.mrb[9].mxu1  ;;  %v2855_v20 = vpop.f32.mrb[13].mxu0 }
 0x2c0   : > { %v1283_v21 = vrot.slane %v1282_v17, 4  ;;  %v1290_v25 = vrot.slane %v1289_v18, 4  ;;  %v712_v26 = vpop.f32.mrb[10].mxu1  ;;  %v761_v27 = vpop.f32.mrb[14].mxu0 }
 0x2c1   : > { %v2850_v28 = vpop.f32.mrb[11].mxu1  ;;  %v2856_v29 = vpop.f32.mrb[15].mxu0 }
 0x2c2   : > { %v1284_v30 = vmax.f32 %v1282_v17, %v1283_v21  ;;  %v1291_v32 = vmax.f32 %v1289_v18, %v1290_v25 }
 0x2c4   : > { %v1285_v34 = vrot.slane %v1284_v30, 2  ;;  %v1292_v35 = vrot.slane %v1291_v32, 2 }
 0x2c6   : > { %v1286_v36 = vmax.f32 %v1284_v30, %v1285_v34  ;;  %v1293_v37 = vmax.f32 %v1291_v32, %v1292_v35  ;;  %v807_v38 = vpop.f32.mrb[12].mxu1  ;;  %v856_v40 = vpop.f32.mrb[16].mxu0 }
 0x2c7   : > { %v1296_v42 = vsel %vm472_vm2, %v807_v38, -inf  ;;  %v1303_v43 = vsel %vm472_vm2, %v856_v40, -inf  ;;  %v2861_v44 = vpop.f32.mrb[13].mxu1  ;;  %v2867_v45 = vpop.f32.mrb[17].mxu0 }
 0x2c8   : > { %v1287_v46 = vrot.slane %v1286_v36, 1  ;;  %v1294_v48 = vrot.slane %v1293_v37, 1  ;;  %v1297_v50 = vrot.slane %v1296_v42, 4  ;;  %v1304_v51 = vrot.slane %v1303_v43, 4  ;;  %v810_v52 = vpop.f32.mrb[14].mxu1  ;;  %v859_v53 = vpop.f32.mrb[18].mxu0 }
 0x2c9   : > { %v2862_v54 = vpop.f32.mrb[15].mxu1  ;;  %v2868_v56 = vpop.f32.mrb[19].mxu0 }
 0x2ca   : > { %v1288_v58 = vmax.f32 %v1286_v36, %v1287_v46  ;;  %v1295_v59 = vmax.f32 %v1293_v37, %v1294_v48  ;;  %v1298_v60 = vmax.f32 %v1296_v42, %v1297_v50  ;;  %v1305_v61 = vmax.f32 %v1303_v43, %v1304_v51 }
 0x2cc   : > { %v1370_v62 = vsub.f32 %v709_v9, %v1288_v58  ;;  %v1371_v1 = vsub.f32 %v758_v13, %v1295_v59  ;;  %v1299_v2 = vrot.slane %v1298_v60, 2  ;;  %v1306_v3 = vrot.slane %v1305_v61, 2 }
 0x2ce   : > { %v1390_v4 = vmul.f32 1.442695, %v1370_v62  ;;  %v1392_v5 = vmul.f32 1.442695, %v1371_v1  ;;  %v1300_v63 = vmax.f32 %v1298_v60, %v1299_v2  ;;  %v1307_v0 = vmax.f32 %v1305_v61, %v1306_v3  ;;  %v3606_v6 = vpop.f32.mrb[20].mxu0 }
 0x2cf   : > { %v905_v7 = vpop.f32.mrb[16].mxu1  ;;  %v1317_v8 = vsel %vm472_vm2, %v3606_v6, -inf  ;;  %v2879_v17 = vpop.f32.mrb[21].mxu0 }
 0x2d0   : > { %3133 = vpow2.f32 %v1390_v4  ;;  %v1301_v18 = vrot.slane %v1300_v63, 1  ;;  %v1308_v19 = vrot.slane %v1307_v0, 1  ;;  %v1310_v20 = vsel %vm472_vm2, %v905_v7, -inf  ;;  %v2873_v9 = vpop.f32.mrb[17].mxu1  ;;  %v957_v13 = vpop.f32.mrb[22].mxu0 }
 0x2d1   : > { %3135 = vpow2.f32 %v1392_v5  ;;  %v1311_v21 = vrot.slane %v1310_v20, 4  ;;  %v1318_v25 = vrot.slane %v1317_v8, 4  ;;  %v908_v26 = vpop.f32.mrb[18].mxu1  ;;  %v2880_v27 = vpop.f32.mrb[23].mxu0 }
 0x2d2   : > { %v1302_v28 = vmax.f32 %v1300_v63, %v1301_v18  ;;  %v1309_v29 = vmax.f32 %v1307_v0, %v1308_v19  ;;  %v2874_v30 = vpop.f32.mrb[19].mxu1 }
 0x2d3   : > { %v1312_v32 = vmax.f32 %v1310_v20, %v1311_v21  ;;  %v1319_v34 = vmax.f32 %v1317_v8, %v1318_v25 }
 0x2d4   : > { %v1372_v35 = vsub.f32 %v807_v38, %v1302_v28  ;;  %v1373_v36 = vsub.f32 %v856_v40, %v1309_v29 }
 0x2d5   : > { %v1313_v37 = vrot.slane %v1312_v32, 2  ;;  %v1320_v42 = vrot.slane %v1319_v34, 2 }
 0x2d6   : > { %v1394_v43 = vmul.f32 1.442695, %v1372_v35  ;;  %v1396_v44 = vmul.f32 1.442695, %v1373_v36  ;;  %v3611_v45 = vpop.f32.mrb[24].mxu0 }
 0x2d7   : > { %v1314_v46 = vmax.f32 %v1312_v32, %v1313_v37  ;;  %v1321_v48 = vmax.f32 %v1319_v34, %v1320_v42  ;;  %v3613_v50 = vpop.f32.mrb[20].mxu1  ;;  %v1331_v51 = vsel %vm472_vm2, %v3611_v45, -inf  ;;  %v2891_v52 = vpop.f32.mrb[25].mxu0 }
 0x2d8   : > { %3137 = vpow2.f32 %v1394_v43  ;;  %v1324_v53 = vsel %vm472_vm2, %v3613_v50, -inf  ;;  %v1332_v38 = vrot.slane %v1331_v51, 4  ;;  %v2885_v40 = vpop.f32.mrb[21].mxu1  ;;  %v1055_v54 = vpop.f32.mrb[26].mxu0 }
 0x2d9   : > { %3139 = vpow2.f32 %v1396_v44  ;;  %v1315_v56 = vrot.slane %v1314_v46, 1  ;;  %v1322_v58 = vrot.slane %v1321_v48, 1  ;;  %v1325_v59 = vrot.slane %v1324_v53, 4  ;;  %v1006_v60 = vpop.f32.mrb[22].mxu1  ;;  %v2892_v61 = vpop.f32.mrb[27].mxu0 }
 0x2da   : > { %v3619_v62 = vpop.eup %3133  ;;  %v1333_v1 = vmax.f32 %v1331_v51, %v1332_v38  ;;  %v2886_v2 = vpop.f32.mrb[23].mxu1 }
 0x2db   : > { %v3621_v3 = vpop.eup %3135  ;;  %v1442_v4 = vsel %vm472_vm2, %v3619_v62, 0.0  ;;  %v1316_v5 = vmax.f32 %v1314_v46, %v1315_v56  ;;  %v1323_v63 = vmax.f32 %v1321_v48, %v1322_v58  ;;  %v1326_v0 = vmax.f32 %v1324_v53, %v1325_v59 }
 0x2dc   : > { %v1443_v8 = vrot.slane %v1442_v4, 4  ;;  %v1449_v17 = vsel %vm472_vm2, %v3621_v3, 0.0  ;;  %v1334_v18 = vrot.slane %v1333_v1, 2 }
 0x2dd   : > { %v1450_v19 = vrot.slane %v1449_v17, 4  ;;  %v1374_v20 = vsub.f32 %v905_v7, %v1316_v5  ;;  %v1375_v9 = vsub.f32 %v3606_v6, %v1323_v63  ;;  %v1327_v13 = vrot.slane %v1326_v0, 2 }
 0x2de   : > { %v1444_v21 = vadd.f32 %v1443_v8, %v1442_v4  ;;  %v1335_v25 = vmax.f32 %v1333_v1, %v1334_v18  ;;  %v3628_v26 = vpop.f32.mrb[28].mxu0 }
 0x2df   : > { %v1451_v27 = vadd.f32 %v1450_v19, %v1449_v17  ;;  %v1398_v28 = vmul.f32 1.442695, %v1374_v20  ;;  %v1400_v29 = vmul.f32 1.442695, %v1375_v9  ;;  %v1328_v30 = vmax.f32 %v1326_v0, %v1327_v13  ;;  %v3630_v32 = vpop.f32.mrb[24].mxu1  ;;  %v2903_v34 = vpop.f32.mrb[29].mxu0 }
 0x2e0   : > { %v1445_v35 = vrot.slane %v1444_v21, 2  ;;  %v1336_v36 = vrot.slane %v1335_v25, 1  ;;  %v1338_v37 = vsel %vm472_vm2, %v3630_v32, -inf  ;;  %v1345_v6 = vsel %vm472_vm2, %v3628_v26, -inf  ;;  %v2897_v7 = vpop.f32.mrb[25].mxu1  ;;  %v1153_v42 = vpop.f32.mrb[30].mxu0 }
 0x2e1   : > { %v1452_v43 = vrot.slane %v1451_v27, 2  ;;  %3141 = vpow2.f32 %v1398_v28  ;;  %v1329_v44 = vrot.slane %v1328_v30, 1  ;;  %v1339_v46 = vrot.slane %v1338_v37, 4  ;;  %v1104_v48 = vpop.f32.mrb[26].mxu1  ;;  %v2904_v51 = vpop.f32.mrb[31].mxu0 }
 0x2e2   : > { %v3636_v52 = vpop.eup %3137  ;;  %v1446_v53 = vadd.f32 %v1445_v35, %v1444_v21  ;;  %3143 = vpow2.f32 %v1400_v29  ;;  %v1337_v38 = vmax.f32 %v1335_v25, %v1336_v36  ;;  %v1346_v40 = vrot.slane %v1345_v6, 4  ;;  %v2898_v54 = vpop.f32.mrb[27].mxu1 }
 0x2e3   : > { %v3638_v56 = vpop.eup %3139  ;;  %v1453_v58 = vadd.f32 %v1452_v43, %v1451_v27  ;;  %v1456_v59 = vsel %vm472_vm2, %v3636_v52, 0.0  ;;  %v1330_v60 = vmax.f32 %v1328_v30, %v1329_v44  ;;  %v1340_v61 = vmax.f32 %v1338_v37, %v1339_v46 }
 0x2e4   : > { %v1447_v1 = vrot.slane %v1446_v53, 1  ;;  %v1457_v2 = vrot.slane %v1456_v59, 4  ;;  %v1463_v4 = vsel %vm472_vm2, %v3638_v56, 0.0  ;;  %v1377_v5 = vsub.f32 %v3611_v45, %v1337_v38 }
 0x2e5   : > { %v1454_v63 = vrot.slane %v1453_v58, 1  ;;  %v1464_v0 = vrot.slane %v1463_v4, 4  ;;  %v1376_v8 = vsub.f32 %v3613_v50, %v1330_v60  ;;  %v1341_v17 = vrot.slane %v1340_v61, 2 }
 0x2e6   : > { %v1448_v18 = vadd.f32 %v1447_v1, %v1446_v53  ;;  %v1458_v19 = vadd.f32 %v1457_v2, %v1456_v59  ;;  %v1404_v20 = vmul.f32 1.442695, %v1377_v5  ;;  %v1347_v9 = vmax.f32 %v1345_v6, %v1346_v40  ;;  %v3646_v13 = vpop.f32.mrb[32].mxu0 }
 0x2e7   : > { %v1455_v21 = vadd.f32 %v1454_v63, %v1453_v58  ;;  %v1465_v25 = vadd.f32 %v1464_v0, %v1463_v4  ;;  %v1402_v27 = vmul.f32 1.442695, %v1376_v8  ;;  %v1342_v28 = vmax.f32 %v1340_v61, %v1341_v17  ;;  %v3648_v29 = vpop.f32.mrb[28].mxu1  ;;  %v2915_v30 = vpop.f32.mrb[33].mxu0 }
 0x2e8   : > { %3145 = vrcp.f32 %v1448_v18  ;;  %v1459_v45 = vrot.slane %v1458_v19, 2  ;;  %v1348_v34 = vrot.slane %v1347_v9, 2  ;;  %v1352_v50 = vsel %vm472_vm2, %v3648_v29, -inf  ;;  %v2909_v35 = vpop.f32.mrb[29].mxu1  ;;  %v1251_v36 = vpop.f32.mrb[34].mxu0 }
 0x2e9   : > { %3147 = vrcp.f32 %v1455_v21  ;;  %v1466_v37 = vrot.slane %v1465_v25, 2  ;;  %v1343_v6 = vrot.slane %v1342_v28, 1  ;;  %v1353_v7 = vrot.slane %v1352_v50, 4  ;;  %v1202_v42 = vpop.f32.mrb[30].mxu1  ;;  %v2916_v43 = vpop.f32.mrb[35].mxu0 }
 0x2ea   : > { %v1460_v44 = vadd.f32 %v1459_v45, %v1458_v19  ;;  %3149 = vpow2.f32 %v1402_v27  ;;  %v1349_v46 = vmax.f32 %v1347_v9, %v1348_v34  ;;  %v1359_v48 = vsel %vm472_vm2, %v3646_v13, -inf  ;;  %v2910_v51 = vpop.f32.mrb[31].mxu1 }
 0x2eb   : > { %v3654_v53 = vpop.eup %3141  ;;  %v1467_v38 = vadd.f32 %v1466_v37, %v1465_v25  ;;  %3151 = vpow2.f32 %v1404_v20  ;;  %v1344_v40 = vmax.f32 %v1342_v28, %v1343_v6  ;;  %v1354_v54 = vmax.f32 %v1352_v50, %v1353_v7  ;;  %v1887_v25 = vpop.permute.xlu0 %1886 }
 0x2ec   : > { %v3656_v58 = vpop.eup %3143  ;;  %v1461_v59 = vrot.slane %v1460_v44, 1  ;;  %v1470_v60 = vsel %vm472_vm2, %v3654_v53, 0.0  ;;  %v1350_v61 = vrot.slane %v1349_v46, 1  ;;  %v1360_v1 = vrot.slane %v1359_v48, 4 }
 0x2ed   : > { %v1468_v2 = vrot.slane %v1467_v38, 1  ;;  %v1471_v4 = vrot.slane %v1470_v60, 4  ;;  %v1477_v5 = vsel %vm472_vm2, %v3656_v58, 0.0  ;;  %v1378_v63 = vsub.f32 %v3630_v32, %v1344_v40 }
 0x2ee   : > { %v1462_v0 = vadd.f32 %v1461_v59, %v1460_v44  ;;  %v1478_v8 = vrot.slane %v1477_v5, 4  ;;  %v1351_v17 = vmax.f32 %v1349_v46, %v1350_v61  ;;  %v1355_v18 = vrot.slane %v1354_v54, 2 }
 0x2ef   : > { %v1469_v19 = vadd.f32 %v1468_v2, %v1467_v38  ;;  %v1472_v20 = vadd.f32 %v1471_v4, %v1470_v60  ;;  %v1406_v9 = vmul.f32 1.442695, %v1378_v63  ;;  %v1361_v21 = vmax.f32 %v1359_v48, %v1360_v1 }
 0x2f0   : > { %3153 = vrcp.f32 %v1462_v0  ;;  %v1479_v27 = vadd.f32 %v1478_v8, %v1477_v5  ;;  %v1379_v28 = vsub.f32 %v3628_v26, %v1351_v17  ;;  %v1356_v30 = vmax.f32 %v1354_v54, %v1355_v18 }
 0x2f1   : > { %3155 = vrcp.f32 %v1469_v19  ;;  %v1473_v45 = vrot.slane %v1472_v20, 2  ;;  %v1362_v34 = vrot.slane %v1361_v21, 2  ;;  %v1892_v6 = vsel %vm1596_vm3, %v1887_v25, 0 }
 0x2f2   : > { %v3146_v50 = vpop.eup %3145  ;;  %v1480_v32 = vrot.slane %v1479_v27, 2  ;;  %3157 = vpow2.f32 %v1406_v9  ;;  %v1408_v35 = vmul.f32 1.442695, %v1379_v28  ;;  %v1357_v36 = vrot.slane %v1356_v30, 1 }
 0x2f3   : > { %v3148_v37 = vpop.eup %3147  ;;  %v1546_v7 = vmul.f32 %v3146_v50, %v3619_v62  ;;  %v1474_v42 = vadd.f32 %v1473_v45, %v1472_v20  ;;  %v1363_v43 = vmax.f32 %v1361_v21, %v1362_v34  ;;  %v1936_v62 = vpop.permute.xlu1 %1935 }
 0x2f4   : > { %v3666_v44 = vpop.eup %3149  ;;  %v1547_v26 = vmul.f32 %v3148_v37, %v3621_v3  ;;  %v1481_v46 = vadd.f32 %v1480_v32, %v1479_v27  ;;  %3159 = vpow2.f32 %v1408_v35  ;;  %v1358_v48 = vmax.f32 %v1356_v30, %v1357_v36  ;;  %v1985_v30 = vpop.permute.xlu0 %1984 }
 0x2f5   : > { %v3669_v51 = vpop.eup %3151  ;;  %1562 = vst.msk [vmem:[%s3572_s13 + $0x20] sm:$0xff] %vm472_vm2, %v1546_v7  ;;  %v1475_v38 = vrot.slane %v1474_v42, 1  ;;  %v1484_v40 = vsel %vm472_vm2, %v3666_v44, 0.0  ;;  %v1364_v54 = vrot.slane %v1363_v43, 1  ;;  %v1578_v59 = vpack.c.bf16 %v1546_v7, %v1546_v7 }
 0x2f6   : > { %1563 = vst.msk [vmem:[%s3572_s13 + $0x28] sm:$0xff] %vm472_vm2, %v1547_v26  ;;  %v1482_v60 = vrot.slane %v1481_v46, 1  ;;  %v1485_v61 = vrot.slane %v1484_v40, 4  ;;  %v1491_v3 = vsel %vm472_vm2, %v3669_v51, 0.0  ;;  %v1380_v1 = vsub.f32 %v3648_v29, %v1358_v48 }
 0x2f7   : > { %v1476_v2 = vadd.f32 %v1475_v38, %v1474_v42  ;;  %v1492_v4 = vrot.slane %v1491_v3, 4  ;;  %v1365_v5 = vmax.f32 %v1363_v43, %v1364_v54  ;;  %2944 = vmatmul.mubr.msk.bf16.vlgmr.msra.gmra.mrb[40].mxu1 %vm472_vm2, %v1578_v59  ;;  %v1579_v63 = vpack.c.bf16 %v1547_v26, %v1547_v26  ;;  %v2034_v36 = vpop.permute.xlu1 %2033 }
 0x2f8   : > { %v1483_v0 = vadd.f32 %v1482_v60, %v1481_v46  ;;  %v1486_v8 = vadd.f32 %v1485_v61, %v1484_v40  ;;  %v1410_v17 = vmul.f32 1.442695, %v1380_v1  ;;  %2954 = vmatpush3.bf16.msra.mxu1 %v1892_v6  ;;  %2955 = vmatprep.mubr.msk.bf16.mxu1 %vm3220_vm1, %v3219_v22  ;;  %v1941_v18 = vsel %vm1596_vm3, %v1936_v62, 0 }
 0x2f9   : > { %3161 = vrcp.f32 %v1476_v2  ;;  %v1493_v19 = vadd.f32 %v1492_v4, %v1491_v3  ;;  %v1381_v20 = vsub.f32 %v3646_v13, %v1365_v5  ;;  %2950 = vmatmul.mubr.msk.bf16.vlgmr.msra.gmra.mrb[44].mxu0 %vm472_vm2, %v1579_v63  ;;  %2965 = vmatprep.subr.bf16.mxu1 %v3219_v22  ;;  %v1990_v42 = vsel %vm1596_vm3, %v1985_v30, 0  ;;  %v2083_v4 = vpop.permute.xlu0 %2082 }
 0x2fa   : > { %v3154_v29 = vpop.eup %3153  ;;  %3163 = vrcp.f32 %v1483_v0  ;;  %v1487_v9 = vrot.slane %v1486_v8, 2  ;;  %2960 = vmatpush3.bf16.msra.mxu0 %v1941_v18  ;;  %2961 = vmatprep.mubr.msk.bf16.mxu0 %vm3220_vm1, %v3219_v22  ;;  %v2039_v38 = vsel %vm1596_vm3, %v2034_v36, 0 }
 0x2fb   : > { %v3156_v21 = vpop.eup %3155  ;;  %v1548_v25 = vmul.f32 %v3154_v29, %v3636_v52  ;;  %v1494_v27 = vrot.slane %v1493_v19, 2  ;;  %3165 = vpow2.f32 %v1410_v17  ;;  %v1412_v28 = vmul.f32 1.442695, %v1381_v20  ;;  %2971 = vmatprep.subr.bf16.mxu0 %v3219_v22  ;;  %v2132_v63 = vpop.permute.xlu1 %2131 }
 0x2fc   : > { %v3691_v13 = vpop.eup %3157  ;;  %v1549_v45 = vmul.f32 %v3156_v21, %v3638_v56  ;;  %v1488_v34 = vadd.f32 %v1487_v9, %v1486_v8  ;;  %v2088_v29 = vsel %vm1596_vm3, %v2083_v4, 0 }
 0x2fd   : > { %1564 = vst.msk [vmem:[%s3572_s13 + $0x30] sm:$0xff] %vm472_vm2, %v1548_v25  ;;  %v1495_v50 = vadd.f32 %v1494_v27, %v1493_v19  ;;  %v1498_v32 = vsel %vm472_vm2, %v3691_v13, 0.0  ;;  %3167 = vpow2.f32 %v1412_v28  ;;  %v1580_v52 = vpack.c.bf16 %v1548_v25, %v1548_v25 }
 0x2fe   : > { %v3698_v35 = vpop.eup %3159  ;;  %1565 = vst.msk [vmem:[%s3572_s13 + $0x38] sm:$0xff] %vm472_vm2, %v1549_v45  ;;  %v1489_v37 = vrot.slane %v1488_v34, 1  ;;  %v1499_v6 = vrot.slane %v1498_v32, 4  ;;  %v1581_v7 = vpack.c.bf16 %v1549_v45, %v1549_v45  ;;  %v2137_v25 = vsel %vm1596_vm3, %v2132_v63, 0 }
 0x2ff   : > { %v1496_v56 = vrot.slane %v1495_v50, 1  ;;  %v1505_v43 = vsel %vm472_vm2, %v3698_v35, 0.0  ;;  %2956 = vmatmul.mubr.msk.bf16.vlgmr.msra.gmra.mrb[44].mxu1 %vm472_vm2, %v1580_v52 }
 0x300   : > { %v1490_v26 = vadd.f32 %v1489_v37, %v1488_v34  ;;  %v1500_v46 = vadd.f32 %v1499_v6, %v1498_v32  ;;  %v1506_v48 = vrot.slane %v1505_v43, 4  ;;  %2966 = vmatpush3.bf16.msra.mxu1 %v1990_v42  ;;  %2967 = vmatprep.mubr.msk.bf16.mxu1 %vm3220_vm1, %v3219_v22  ;;  %v2181_v6 = vpop.permute.xlu0 %2180  ;;  %v2230_v42 = vpop.permute.xlu1 %2229 }
 0x301   : > { %v1497_v40 = vadd.f32 %v1496_v56, %v1495_v50  ;;  %2962 = vmatmul.mubr.msk.bf16.vlgmr.msra.gmra.mrb[48].mxu0 %vm472_vm2, %v1581_v7  ;;  %2977 = vmatprep.subr.bf16.mxu1 %v3219_v22 }
 0x302   : > { %3169 = vrcp.f32 %v1490_v26  ;;  %v1501_v54 = vrot.slane %v1500_v46, 2  ;;  %v1507_v59 = vadd.f32 %v1506_v48, %v1505_v43  ;;  %2972 = vmatpush3.bf16.msra.mxu0 %v2039_v38  ;;  %2973 = vmatprep.mubr.msk.bf16.mxu0 %vm3220_vm1, %v3219_v22  ;;  %v2186_v48 = vsel %vm1596_vm3, %v2181_v6, 0 }
 0x303   : > { %v3162_v62 = vpop.eup %3161  ;;  %3171 = vrcp.f32 %v1497_v40  ;;  %2983 = vmatprep.subr.bf16.mxu0 %v3219_v22 }
 0x304   : > { %v3164_v60 = vpop.eup %3163  ;;  %v1550_v61 = vmul.f32 %v3162_v62, %v3654_v53  ;;  %v1502_v3 = vadd.f32 %v1501_v54, %v1500_v46  ;;  %v1508_v1 = vrot.slane %v1507_v59, 2 }
 0x305   : > { %v3715_v2 = vpop.eup %3165  ;;  %v1551_v5 = vmul.f32 %v3164_v60, %v3656_v58  ;;  %v2279_v60 = vpop.permute.xlu0 %2278 }
 0x306   : > { %1566 = vst.msk [vmem:[%s3572_s13 + $0x40] sm:$0xff] %vm472_vm2, %v1550_v61  ;;  %v1503_v0 = vrot.slane %v1502_v3, 1  ;;  %v1509_v8 = vadd.f32 %v1508_v1, %v1507_v59  ;;  %v1512_v17 = vsel %vm472_vm2, %v3715_v2, 0.0  ;;  %v1582_v18 = vpack.c.bf16 %v1550_v61, %v1550_v61  ;;  %v2328_v1 = vpop.permute.xlu1 %2327 }
 0x307   : > { %v3722_v19 = vpop.eup %3167  ;;  %1567 = vst.msk [vmem:[%s3572_s13 + $0x48] sm:$0xff] %vm472_vm2, %v1551_v5  ;;  %v1513_v53 = vrot.slane %v1512_v17, 4  ;;  %v1583_v20 = vpack.c.bf16 %v1551_v5, %v1551_v5  ;;  %v2284_v4 = vsel %vm1596_vm3, %v2279_v60, 0  ;;  %v2333_v5 = vsel %vm1596_vm3, %v2328_v1, 0 }
 0x308   : > { %v1504_v9 = vadd.f32 %v1503_v0, %v1502_v3  ;;  %v1510_v21 = vrot.slane %v1509_v8, 1  ;;  %v1519_v58 = vsel %vm472_vm2, %v3722_v19, 0.0  ;;  %2968 = vmatmul.mubr.msk.bf16.vlgmr.msra.gmra.mrb[48].mxu1 %vm472_vm2, %v1582_v18 }
 0x309   : > { %v1514_v27 = vadd.f32 %v1513_v53, %v1512_v17  ;;  %v1520_v28 = vrot.slane %v1519_v58, 4  ;;  %2974 = vmatmul.mubr.msk.bf16.vlgmr.msra.gmra.mrb[52].mxu0 %vm472_vm2, %v1583_v20  ;;  %2978 = vmatpush3.bf16.msra.mxu1 %v2088_v29 }
 0x30a   : > { %3173 = vrcp.f32 %v1504_v9  ;;  %v1511_v30 = vadd.f32 %v1510_v21, %v1509_v8  ;;  %2984 = vmatpush3.bf16.msra.mxu0 %v2137_v25  ;;  %2979 = vmatprep.mubr.msk.bf16.mxu1 %vm3220_vm1, %v3219_v22 }
 0x30b   : > { %v1515_v45 = vrot.slane %v1514_v27, 2  ;;  %v1521_v34 = vadd.f32 %v1520_v28, %v1519_v58  ;;  %2985 = vmatprep.mubr.msk.bf16.mxu0 %vm3220_vm1, %v3219_v22  ;;  %2989 = vmatprep.subr.bf16.mxu1 %v3219_v22 }
 0x30c   : > { %v3170_v50 = vpop.eup %3169  ;;  %3175 = vrcp.f32 %v1511_v30  ;;  %2995 = vmatprep.subr.bf16.mxu0 %v3219_v22 }
 0x30d   : > { %v3172_v32 = vpop.eup %3171  ;;  %v1552_v52 = vmul.f32 %v3170_v50, %v3666_v44  ;;  %v1516_v36 = vadd.f32 %v1515_v45, %v1514_v27  ;;  %v1522_v37 = vrot.slane %v1521_v34, 2  ;;  %v2235_v44 = vsel %vm1596_vm3, %v2230_v42, 0 }
 0x30e   : > { %v1553_v7 = vmul.f32 %v3172_v32, %v3669_v51 }
 0x30f   : > { %1568 = vst.msk [vmem:[%s3572_s13 + $0x50] sm:$0xff] %vm472_vm2, %v1552_v52  ;;  %v1517_v56 = vrot.slane %v1516_v36, 1  ;;  %v1523_v43 = vadd.f32 %v1522_v37, %v1521_v34  ;;  %v1584_v26 = vpack.c.bf16 %v1552_v52, %v1552_v52 }
 0x310   : > { %1569 = vst.msk [vmem:[%s3572_s13 + $0x58] sm:$0xff] %vm472_vm2, %v1553_v7  ;;  %v1585_v46 = vpack.c.bf16 %v1553_v7, %v1553_v7 }
 0x311   : > { %v1518_v38 = vadd.f32 %v1517_v56, %v1516_v36  ;;  %v1524_v40 = vrot.slane %v1523_v43, 1  ;;  %2980 = vmatmul.mubr.msk.bf16.vlgmr.msra.gmra.mrb[52].mxu1 %vm472_vm2, %v1584_v26 }
 0x312   : > { %2986 = vmatmul.mubr.msk.bf16.vlgmr.msra.gmra.mrb[56].mxu0 %vm472_vm2, %v1585_v46  ;;  %2990 = vmatpush3.bf16.msra.mxu1 %v2186_v48 }
 0x313   : > { %3177 = vrcp.f32 %v1518_v38  ;;  %v1525_v51 = vadd.f32 %v1524_v40, %v1523_v43  ;;  %2996 = vmatpush3.bf16.msra.mxu0 %v2235_v44  ;;  %2991 = vmatprep.mubr.msk.bf16.mxu1 %vm3220_vm1, %v3219_v22 }
 0x314   : > { %v3174_v54 = vpop.eup %3173  ;;  %2997 = vmatprep.mubr.msk.bf16.mxu0 %vm3220_vm1, %v3219_v22  ;;  %3001 = vmatprep.subr.bf16.mxu1 %v3219_v22 }
 0x315   : > { %v1554_v59 = vmul.f32 %v3174_v54, %v3691_v13  ;;  %3179 = vrcp.f32 %v1525_v51  ;;  %3007 = vmatprep.subr.bf16.mxu0 %v3219_v22 }
 0x316   : > { %v3176_v62 = vpop.eup %3175 }
 0x317   : > { %1570 = vst.msk [vmem:[%s3572_s13 + $0x60] sm:$0xff] %vm472_vm2, %v1554_v59  ;;  %v1555_v61 = vmul.f32 %v3176_v62, %v3698_v35  ;;  %v1586_v3 = vpack.c.bf16 %v1554_v59, %v1554_v59 }
 0x319   : > { %1571 = vst.msk [vmem:[%s3572_s13 + $0x68] sm:$0xff] %vm472_vm2, %v1555_v61  ;;  %2992 = vmatmul.mubr.msk.bf16.vlgmr.msra.gmra.mrb[56].mxu1 %vm472_vm2, %v1586_v3  ;;  %v1587_v13 = vpack.c.bf16 %v1555_v61, %v1555_v61 }
 0x31a   : > { %3002 = vmatpush3.bf16.msra.mxu1 %v2284_v4  ;;  %3003 = vmatprep.mubr.msk.bf16.mxu1 %vm3220_vm1, %v3219_v22 }
 0x31b   : > { %2998 = vmatmul.mubr.msk.bf16.vlgmr.msra.gmra.mrb[60].mxu0 %vm472_vm2, %v1587_v13 }
 0x31c   : > { %3008 = vmatpush3.bf16.msra.mxu0 %v2333_v5  ;;  %3009 = vmatprep.mubr.msk.bf16.mxu0 %vm3220_vm1, %v3219_v22 }
 0x31d   : > { %v3178_v35 = vpop.eup %3177 }
 0x31e   : > { %v1556_v63 = vmul.f32 %v3178_v35, %v3715_v2 }
 0x31f   : > { %v3180_v0 = vpop.eup %3179 }
 0x320   : > { %1572 = vst.msk [vmem:[%s3572_s13 + $0x70] sm:$0xff] %vm472_vm2, %v1556_v63  ;;  %v1557_v8 = vmul.f32 %v3180_v0, %v3722_v19  ;;  %v1588_v17 = vpack.c.bf16 %v1556_v63, %v1556_v63 }
 0x322   : > { %1573 = vst.msk [vmem:[%s3572_s13 + $0x78] sm:$0xff] %vm472_vm2, %v1557_v8  ;;  %3004 = vmatmul.mubr.msk.bf16.vlgmr.msra.gmra.mrb[60].mxu1 %vm472_vm2, %v1588_v17  ;;  %v1589_v18 = vpack.c.bf16 %v1557_v8, %v1557_v8 }
 0x324   : > { %3010 = vmatmul.mubr.msk.bf16.vlgmr.msra.gmra.mrb[64].mxu0 %vm472_vm2, %v1589_v18 }
 0x35f   : > { %v3776_v53 = vpop.f32.mrb[36].mxu0 }
 0x360   : > { %v3778_v20 = vpop.f32.mrb[32].mxu1  ;;  %v2927_v22 = vpop.f32.mrb[37].mxu0 }
 0x361   : > { %v2921_v29 = vpop.f32.mrb[33].mxu1  ;;  %v1686_v2 = vpop.f32.mrb[38].mxu0 }
 0x362   : > { %v1637_v9 = vpop.f32.mrb[34].mxu1  ;;  %v2928_v21 = vpop.f32.mrb[39].mxu0 }
 0x363   : > { %v2922_v58 = vpop.f32.mrb[35].mxu1 }
 0x368   : > { %v3780_v25 = vpop.f32.mrb[40].mxu0 }
 0x369   : > { %v3782_v19 = vpop.f32.mrb[36].mxu1  ;;  %v2939_v27 = vpop.f32.mrb[41].mxu0 }
 0x36a   : > { %v2933_v28 = vpop.f32.mrb[37].mxu1  ;;  %v1784_v30 = vpop.f32.mrb[42].mxu0 }
 0x36b   : > { %v1735_v45 = vpop.f32.mrb[38].mxu1  ;;  %v2940_v34 = vpop.f32.mrb[43].mxu0 }
 0x36c   : > { %v2934_v50 = vpop.f32.mrb[39].mxu1 }
 0x3ca   : > { %v1830_v32 = vpop.f32.mrb[40].mxu1 }
 0x3cb   : > { %v2379_v52 = vadd.f32 %v1830_v32, %v3443_v12  ;;  %v2945_v36 = vpop.f32.mrb[41].mxu1 }
 0x3cc   : > { %v1879_v37 = vpop.f32.mrb[44].mxu0  ;;  %v1833_v6 = vpop.f32.mrb[42].mxu1 }
 0x3cd   : > { %v2380_v7 = vadd.f32 %v1879_v37, %v3441_v10  ;;  %v2951_v42 = vpop.f32.mrb[45].mxu0  ;;  %2395 = vrot.lane.b32.xlu0 %v2379_v52, %s3224_s15  ;;  %v2946_v56 = vpop.f32.mrb[43].mxu1 }
 0x3ce   : > { %v1882_v43 = vpop.f32.mrb[46].mxu0 }
 0x3cf   : > { %2397 = vrot.lane.b32.xlu1 %v2380_v7, %s3224_s15  ;;  %v2952_v26 = vpop.f32.mrb[47].mxu0 }
 0x3d2   : > { %v1928_v46 = vpop.f32.mrb[44].mxu1 }
 0x3d3   : > { %v2381_v48 = vadd.f32 %v1928_v46, %v3461_v24  ;;  %v2957_v38 = vpop.f32.mrb[45].mxu1 }
 0x3d4   : > { %v1977_v40 = vpop.f32.mrb[48].mxu0  ;;  %v1931_v44 = vpop.f32.mrb[46].mxu1 }
 0x3d5   : > { %v2382_v12 = vadd.f32 %v1977_v40, %v3459_v23  ;;  %v2963_v51 = vpop.f32.mrb[49].mxu0  ;;  %2399 = vrot.lane.b32.xlu0 %v2381_v48, %s3224_s15  ;;  %v2958_v54 = vpop.f32.mrb[47].mxu1 }
 0x3d6   : > { %v1980_v59 = vpop.f32.mrb[50].mxu0 }
 0x3d7   : > { %2401 = vrot.lane.b32.xlu1 %v2382_v12, %s3224_s15  ;;  %v2964_v10 = vpop.f32.mrb[51].mxu0  ;;  %s264_s15 = scalar_lea.vmem %s3879_s5, %s2690_s14 }
 0x3db   : > { %v2026_v62 = vpop.f32.mrb[48].mxu1 }
 0x3dc   : > { %v2383_v60 = vadd.f32 %v2026_v62, %v3485_v33  ;;  %v2075_v61 = vpop.f32.mrb[52].mxu0  ;;  %v2969_v3 = vpop.f32.mrb[49].mxu1  ;;  %v3115_v33 = vld [vmem:[%s3877_s3] sm:$0xff]  }
 0x3dd   : > { %v2384_v1 = vadd.f32 %v2075_v61, %v3479_v31  ;;  %v2975_v4 = vpop.f32.mrb[53].mxu0  ;;  %v2029_v24 = vpop.f32.mrb[50].mxu1  ;;  %3013 = vmatprep.subr.bf16.mxu1 %v3115_v33  ;;  %v2377_v3 = vadd.f32 %v3782_v19, %v3343_v16 }
 0x3de   : > { %v2078_v13 = vpop.f32.mrb[54].mxu0  ;;  %2411 = vrot.lane.b32.xlu0 %v2383_v60, %s3225_s16  ;;  %v2970_v5 = vpop.f32.mrb[51].mxu1  ;;  %3014 = vmatpush3.bf16.msra.mxu1 %v3115_v33 }
 0x3df   : > { %2413 = vrot.lane.b32.xlu1 %v2384_v1, %s3225_s16  ;;  %v2976_v23 = vpop.f32.mrb[55].mxu0 }
 0x3e4   : > { %v2124_v35 = vpop.f32.mrb[52].mxu1 }
 0x3e5   : > { %v2385_v63 = vadd.f32 %v2124_v35, %v3504_v41  ;;  %v2173_v0 = vpop.f32.mrb[56].mxu0  ;;  %v2981_v8 = vpop.f32.mrb[53].mxu1  ;;  %v3116_v41 = vld [vmem:[%s3877_s3 + $0x8] sm:$0xff]  }
 0x3e6   : > { %v2386_v17 = vadd.f32 %v2173_v0, %v3497_v39  ;;  %v2987_v31 = vpop.f32.mrb[57].mxu0  ;;  %v2127_v18 = vpop.f32.mrb[54].mxu1  ;;  %3015 = vmatprep.subr.bf16.mxu1 %v3116_v41 }
 0x3e7   : > { %v2176_v22 = vpop.f32.mrb[58].mxu0  ;;  %2415 = vrot.lane.b32.xlu0 %v2385_v63, %s3225_s16  ;;  %v2982_v29 = vpop.f32.mrb[55].mxu1  ;;  %3016 = vmatpush3.bf16.msra.mxu1 %v3116_v41 }
 0x3e8   : > { %2417 = vrot.lane.b32.xlu1 %v2386_v17, %s3225_s16  ;;  %v2988_v2 = vpop.f32.mrb[59].mxu0 }
 0x3ec   : > { %v2222_v9 = vpop.f32.mrb[56].mxu1 }
 0x3ed   : > { %v2387_v21 = vadd.f32 %v2222_v9, %v3524_v49  ;;  %v2993_v58 = vpop.f32.mrb[57].mxu1 }
 0x3ee   : > { %v2271_v39 = vpop.f32.mrb[60].mxu0  ;;  %v2225_v27 = vpop.f32.mrb[58].mxu1 }
 0x3ef   : > { %v2388_v28 = vadd.f32 %v2271_v39, %v3517_v47  ;;  %v2999_v30 = vpop.f32.mrb[61].mxu0  ;;  %2427 = vrot.lane.b32.xlu0 %v2387_v21, %s3226_s26  ;;  %v2994_v45 = vpop.f32.mrb[59].mxu1 }
 0x3f0   : > { %v2274_v34 = vpop.f32.mrb[62].mxu0 }
 0x3f1   : > { %2429 = vrot.lane.b32.xlu1 %v2388_v28, %s3226_s26  ;;  %v3000_v50 = vpop.f32.mrb[63].mxu0 }
 0x3f5   : > { %v2320_v32 = vpop.f32.mrb[60].mxu1 }
 0x3f6   : > { %v2389_v52 = vadd.f32 %v2320_v32, %v3545_v57  ;;  %v3005_v36 = vpop.f32.mrb[61].mxu1  ;;  %v2375_v57 = vadd.f32 %v3778_v20, %v3337_v11 }
 0x3f7   : > { %v2369_v37 = vpop.f32.mrb[64].mxu0  ;;  %v2323_v6 = vpop.f32.mrb[62].mxu1 }
 0x3f8   : > { %v2390_v49 = vadd.f32 %v2369_v37, %v3538_v55  ;;  %v3011_v7 = vpop.f32.mrb[65].mxu0  ;;  %2431 = vrot.lane.b32.xlu0 %v2389_v52, %s3226_s26  ;;  %v3006_v42 = vpop.f32.mrb[63].mxu1  ;;  %v2376_v55 = vadd.f32 %v3776_v53, %v3341_v15  ;;  %v2378_v15 = vadd.f32 %v3780_v25, %v3339_v14  ;;  %v2730_v14 = vld [vmem:[%s3878_s4] ss:$0 sm:$0xff] }
 0x3f9   : > { %v2372_v56 = vpop.f32.mrb[66].mxu0 }
 0x3fa   : > { %2433 = vrot.lane.b32.xlu1 %v2390_v49, %s3226_s26  ;;  %v3012_v47 = vpop.f32.mrb[67].mxu0 }
 0x43f   : > { %v2396_v43 = vpop.permute.xlu0 %2395 }
 0x440   : > { %v2439_v51 = vsel %vm472_vm2, %v2375_v57, %v2396_v43 }
 0x441   : > { %v2398_v26 = vpop.permute.xlu1 %2397 }
 0x442   : > { %v2440_v10 = vsel %vm472_vm2, %v2376_v55, %v2398_v26 }
 0x447   : > { %v2400_v46 = vpop.permute.xlu0 %2399 }
 0x448   : > { %v2441_v53 = vsel %vm472_vm2, %v2377_v3, %v2400_v46 }
 0x449   : > { %v2402_v48 = vpop.permute.xlu1 %2401 }
 0x44a   : > { %v2442_v24 = vsel %vm472_vm2, %v2378_v15, %v2402_v48 }
 0x450   : > { %v2412_v38 = vpop.permute.xlu0 %2411 }
 0x451   : > { %v2414_v40 = vpop.permute.xlu1 %2413  ;;  %v2444_v54 = vsel %vm2443_vm4, %v2439_v51, %v2412_v38 }
 0x452   : > { %v2445_v60 = vsel %vm2443_vm4, %v2440_v10, %v2414_v40 }
 0x459   : > { %v2416_v44 = vpop.permute.xlu0 %2415 }
 0x45a   : > { %v2418_v12 = vpop.permute.xlu1 %2417  ;;  %v2446_v1 = vsel %vm2443_vm4, %v2441_v53, %v2416_v44 }
 0x45b   : > { %v2447_v5 = vsel %vm2443_vm4, %v2442_v24, %v2418_v12 }
 0x461   : > { %v2428_v59 = vpop.permute.xlu0 %2427 }
 0x462   : > { %v2449_v62 = vsel %vm2448_vm5, %v2444_v54, %v2428_v59 }
 0x463   : > { %v2430_v61 = vpop.permute.xlu1 %2429 }
 0x464   : > { %v2450_v11 = vsel %vm2448_vm5, %v2445_v60, %v2430_v61 }
 0x465   : > { %v2453_v20 = vpack.c.bf16 %v2450_v11, %v2449_v62 }
 0x467   : > { %3017 = vmatprep.mubr.msk.bf16.mxu1 %vm297_vm0, %v2453_v20 }
 0x46a   : > { %v2432_v4 = vpop.permute.xlu0 %2431 }
 0x46b   : > { %v2451_v13 = vsel %vm2448_vm5, %v2446_v1, %v2432_v4 }
 0x46c   : > { %v2434_v23 = vpop.permute.xlu1 %2433 }
 0x46d   : > { %v2452_v16 = vsel %vm2448_vm5, %v2447_v5, %v2434_v23 }
 0x46e   : > { %v2454_v19 = vpack.c.bf16 %v2452_v16, %v2451_v13 }
 0x470   : > { %3018 = vmatmul.mubr.msk.bf16.vlgmr.msra.gmra.mrb[64].mxu1 %vm297_vm0, %v2454_v19 }
 0x543   : > { %v3019_v25 = vpop.f32.mrb[64].mxu1 }
 0x544   : > { %v2527_v35 = vadd.f32 %v3019_v25, %v2730_v14  ;;  %v2518_v63 = vpop.f32.mrb[65].mxu1 }
 0x545   : > { %v2519_v0 = vadd.f32 %v2730_v14, %v2518_v63  ;;  %v3020_v8 = vpop.f32.mrb[66].mxu1 }
 0x546   : > { %v2530_v33 = vadd.f32 %v3020_v8, %v2730_v14  ;;  %v2521_v17 = vpop.f32.mrb[67].mxu1  ;;  %v2535_v22 = vmax.f32 %v2527_v35, 0.0 }
 0x547   : > { %v2533_v31 = vmax.f32 %v2519_v0, 0.0  ;;  %v2522_v18 = vadd.f32 %v2730_v14, %v2521_v17 }
 0x548   : > { %v2536_v2 = vmax.f32 %v2530_v33, 0.0  ;;  %v2539_v21 = vadd.f32 %v2535_v22, %v2451_v13 }
 0x549   : > { %v2537_v29 = vadd.f32 %v2533_v31, %v2449_v62  ;;  %v2534_v41 = vmax.f32 %v2522_v18, 0.0 }
 0x54a   : > { %v2540_v58 = vadd.f32 %v2536_v2, %v2452_v16  ;;  %2543 = vst.msk [vmem:[%s264_s15 + $0x10] sm:$0xff] %vm297_vm0, %v2539_v21 }
 0x54b   : > { %2541 = vst.msk [vmem:[%s264_s15] sm:$0xff] %vm297_vm0, %v2537_v29  ;;  %v2538_v9 = vadd.f32 %v2534_v41, %v2450_v11 }
 0x54c   : > { %2544 = vst.msk [vmem:[%s264_s15 + $0x18] sm:$0xff] %vm297_vm0, %v2540_v58 }
 0x54d   : > { %2542 = vst.msk [vmem:[%s264_s15 + $0x8] sm:$0xff] %vm297_vm0, %v2538_v9 }
 0x54e   : > { %s2740_s14 = sshll.u32 %s3290_s25, 9  ;;  %s2584_s16 = sshll.u32 %s3572_s13, 4  ;;  %s2585_s16 = int_to_ptr.vmem [resolvable:$true] %s2584_s16 }
 0x54f   : > { %s2567_s19 = scalar_lea.hbm %s3880_s6, %s2740_s14  ;;  %s3227_s20 = smov 512  }
 0x550   : > { %3021 = sst [smem:[#allocation5]] (%p3307_p5), %s3227_s20  ;;  %s3228_s10 = smov 1024  }
 0x551   : > { %3022 = sst [smem:[#allocation5 + $0x1]] (%p3307_p5), %s3228_s10  ;;  %s3229_s26 = smov 4  }
 0x552   : > { %3023 = sst [smem:[#allocation5 + $0x2]] (%p3307_p5), %s3229_s26  ;;  %s3230_s28 = smov 128  }
 0x553   : > { %3024 = sst [smem:[#allocation5 + $0x3]] (%p3307_p5), %s3230_s28  ;;  %s3231_s25 = smov 8  }
 0x554   : > { %3025 = sst [smem:[#allocation5 + $0x4]] (%p3307_p5), %s3230_s28  ;;  %s3232_s13 = smov [#allocation4]  }
 0x555   : > { %3026 = sst [smem:[#allocation5 + $0x5]] (%p3307_p5), %s3231_s25  ;;  %s3233_s29 = smov 0  }
 0x556   : > { %3027 = dma.general (%p3307_p5), %s2585_s16, 2048, %s2567_s19, %s2551_s11, %s3232_s13, [#allocation5], %s3233_s29, 0  }
 0x557 PF: > { %p3033_p11 = scmp.ge.s32.totalorder %s3215_s24, 2  ;;  %s2620_s9 = sand.u32 1, %s3203_s21  }
 0x558   : > { %s2621_s12 = scalar_lea.sflag [#allocation3], %s2620_s9 }
 0x559   : > { %p3030_p12 = pnand %p3033_p11, %p3311_p6 }
 0x55b   : > { %3198 = dma.done.wait (!%p3030_p12), %s2621_s12, 2048  }
 0x55c   : > { %3200 = vsyncadd (!%p3030_p12), %s2621_s12, 4294965248  ;;  %p17_p13 = scmp.ge.s32.totalorder %s3294_s27, 4   ;;  %s3883_s21 = smov %s3207_s22 }
 0x55d   : > { %s3884_s22 = smov %s3211_s23  ;;  %s3885_s23 = smov %s3305_s30 }
 0x55e   : > { %s3886_s24 = smov %s3294_s27  ;;  %19 = sbr.rel (!%p17_p13) target bundleno = 3 (0x3), region = 92 }
 0x565   :  { %2626 = vsyncpa [#allocation3], 1 }
 0x566   :  { %2628 = vsyncpa [#allocation3 + $0x1], 1 }

</bundles_post_ra>
